<compile_context>
chip_gen: v6e
topology: v6e:2x2x1
jax: 0.10.0
libtpu: 0.0.40
codegen_flags: <defaults>
</compile_context>

<pallas_src>
import functools

import jax
import jax.numpy as jnp
from jax.experimental import pallas as pl
from jax.experimental.pallas import tpu as pltpu


def _round_up(x, m):
    return ((x + m - 1) // m) * m


def _padded_bytes(shape, dtype_bytes):
    """Rough VMEM footprint of an array, accounting for (sublane, lane) tile padding."""
    dims = list(shape)
    if len(dims) >= 1:
        dims[-1] = _round_up(dims[-1], 128)
    if len(dims) >= 2:
        sub = 16 if dtype_bytes == 2 else 8
        dims[-2] = _round_up(dims[-2], sub)
    n = 1
    for d in dims:
        n *= int(d)
    return n * dtype_bytes


def _vmem_budget_bytes():
    cap = 64 * 1024 * 1024
    try:
        info = pltpu.get_tpu_info()
        cap = int(getattr(info, "vmem_capacity_bytes", cap))
    except Exception:
        pass
    return int(cap * 0.7)


def _estimate_vmem_bytes(tt, b_blk, g, g_next, h, fuse_next):
    """Estimated VMEM use for one time block (inputs/outputs double-buffered)."""
    total = 0
    total += 2 * _padded_bytes((tt, b_blk, g), 2)          # xg input (bf16)
    total += 2 * _padded_bytes((1, g), 4)                   # bias (fp32)
    total += 2 * _padded_bytes((h, g), 2)                   # W_hh^T (bf16)
    if fuse_next:
        total += 2 * _padded_bytes((h, g_next), 2)          # W_ih^T of next layer (bf16)
        total += 2 * _padded_bytes((tt, b_blk, g_next), 2)  # xg_next output (bf16)
    total += 2 * 2 * _padded_bytes((b_blk, h), 4)           # resident hN/cN outputs (fp32)
    return total


def _pick_time_block(T, b_blk, g, g_next, h, fuse_next, budget_bytes):
    """Largest divisor of T whose block fits in the VMEM budget."""
    best = 1
    for tt in range(1, T + 1):
        if T % tt:
            continue
        if _estimate_vmem_bytes(tt, b_blk, g, g_next, h, fuse_next) <= budget_bytes:
            best = tt
    return best


def _lstm_block_kernel(*refs, fuse_next, unroll):
    """Serial LSTM recurrence over one (batch-split, time-block) grid cell.

    Inputs:
      xg_ref      : (TT, Bblk, 4H) bf16   precomputed x_t @ W_ih^T (NO bias)
      bias_ref    : (1, 4H)        fp32   b_ih + b_hh (added in-kernel)
      whh_ref     : (H, 4H)        bf16   pre-transposed recurrent weights
      [wih_next_ref: (H, 4H_next)  bf16   next layer's pre-transposed input weights]
    Outputs:
      [xg_next_ref: (TT, Bblk, 4H_next) bf16   fused next-layer input projection]
      hN_ref/cN_ref: (Bblk, H) fp32   recurrent state; resident across the time axis
                                      (constant index map) and doubles as the carry.
    """
    if fuse_next:
        (xg_ref, bias_ref, whh_ref, wih_next_ref,
         xg_next_ref, hN_ref, cN_ref) = refs
    else:
        (xg_ref, bias_ref, whh_ref, hN_ref, cN_ref) = refs
        wih_next_ref = None
        xg_next_ref = None

    tblk = pl.program_id(1)
    TT, Bblk, G = xg_ref.shape
    H = whh_ref.shape[0]

    @pl.when(tblk == 0)
    def _():
        hN_ref[...] = jnp.zeros_like(hN_ref)
        cN_ref[...] = jnp.zeros_like(cN_ref)

    # Hoist weight loads and the bias broadcast out of the time loop.
    whh = whh_ref[...]                                              # (H, 4H) bf16
    bias = jnp.broadcast_to(bias_ref[...], (Bblk, G)).astype(jnp.float32)
    if fuse_next:
        wih_next = wih_next_ref[...]                                # (H, 4H_next) bf16

    def step(t, carry):
        h_prev, c_prev = carry                                      # fp32 (Bblk, H)
        gates = (jnp.dot(h_prev.astype(whh.dtype), whh,
                         preferred_element_type=jnp.float32)
                 + xg_ref[t].astype(jnp.float32) + bias)            # (Bblk, 4H) fp32
        i_g = jax.nn.sigmoid(gates[:, 0 * H:1 * H])
        f_g = jax.nn.sigmoid(gates[:, 1 * H:2 * H])
        g_g = jnp.tanh(gates[:, 2 * H:3 * H])
        o_g = jax.nn.sigmoid(gates[:, 3 * H:4 * H])
        c_new = f_g * c_prev + i_g * g_g
        h_new = o_g * jnp.tanh(c_new)
        if fuse_next:
            # Fused next-layer input projection (no time dependency; off the critical
            # path; 4H_next-wide store is lane-dense).
            xg_next_ref[t] = jnp.dot(h_new.astype(wih_next.dtype), wih_next,
                                     preferred_element_type=jnp.float32
                                     ).astype(xg_next_ref.dtype)
        return (h_new, c_new)

    h_f, c_f = jax.lax.fori_loop(0, TT, step, (hN_ref[...], cN_ref[...]),
                                 unroll=unroll)

    # Persist the carry for the next time block (also the final output).
    hN_ref[...] = h_f
    cN_ref[...] = c_f


def lstm_layer(xg, bias, whh_t, wih_next_t, *, n_bsplit, vmem_budget,
               out_dtype=jnp.bfloat16):
    """One LSTM layer.

    xg        : (T, B_pad, 4H) bf16 — x @ W_ih^T for this layer (bias NOT included)
    bias      : (1, 4H) fp32 (b_ih + b_hh)
    whh_t     : (H, 4H) bf16
    wih_next_t: (H, 4H_next) bf16 or None for the last layer
    Returns (xg_next or None, h_final (B_pad,H) fp32, c_final (B_pad,H) fp32).
    """
    T, B, G = xg.shape
    H = whh_t.shape[0]
    fuse_next = wih_next_t is not None
    Gn = wih_next_t.shape[1] if fuse_next else 0
    Bblk = B // n_bsplit

    tt = _pick_time_block(T, Bblk, G, Gn, H, fuse_next, vmem_budget)
    n_tblocks = T // tt

    in_specs = [
        pl.BlockSpec((tt, Bblk, G), lambda b, i: (i, b, 0)),   # xg
        pl.BlockSpec((1, G), lambda b, i: (0, 0)),             # bias
        pl.BlockSpec((H, G), lambda b, i: (0, 0)),             # W_hh^T
    ]
    args = [xg, bias, whh_t]

    out_shapes = []
    out_specs = []
    if fuse_next:
        in_specs.append(pl.BlockSpec((H, Gn), lambda b, i: (0, 0)))
        args.append(wih_next_t)
        out_shapes.append(jax.ShapeDtypeStruct((T, B, Gn), out_dtype))
        out_specs.append(pl.BlockSpec((tt, Bblk, Gn), lambda b, i: (i, b, 0)))
    out_shapes += [jax.ShapeDtypeStruct((B, H), jnp.float32),
                   jax.ShapeDtypeStruct((B, H), jnp.float32)]
    out_specs += [pl.BlockSpec((Bblk, H), lambda b, i: (b, 0)),
                  pl.BlockSpec((Bblk, H), lambda b, i: (b, 0))]

    grid_spec = pltpu.PrefetchScalarGridSpec(
        num_scalar_prefetch=0,
        grid=(n_bsplit, n_tblocks),
        in_specs=in_specs,
        out_specs=out_specs,
    )

    outs = pl.pallas_call(
        functools.partial(_lstm_block_kernel, fuse_next=fuse_next,
                          unroll=min(tt, 8)),
        out_shape=tuple(out_shapes),
        grid_spec=grid_spec,
        compiler_params=pltpu.CompilerParams(
            dimension_semantics=("parallel", "arbitrary"),  # batch parallel, time serial
            vmem_limit_bytes=int(vmem_budget)),
    )(*args)

    if fuse_next:
        xg_next, h_f, c_f = outs
        return xg_next, h_f, c_f
    h_f, c_f = outs
    return None, h_f, c_f


def init_encoder_params(key, input_size, embedding_size, hidden_size, num_layers):
    """PyTorch-style init; weights stored pre-transposed (bf16), biases pre-summed (fp32)."""
    params = {}
    key, k_emb = jax.random.split(key)
    params["embedding"] = jax.random.normal(
        k_emb, (input_size, embedding_size), jnp.float32)  # nn.Embedding ~ N(0,1)

    bound = 1.0 / jnp.sqrt(hidden_size)
    layers = []
    for l in range(num_layers):
        in_dim = embedding_size if l == 0 else hidden_size
        key, k1, k2, k3, k4 = jax.random.split(key, 5)
        w_ih = jax.random.uniform(k1, (4 * hidden_size, in_dim), jnp.float32, -bound, bound)
        w_hh = jax.random.uniform(k2, (4 * hidden_size, hidden_size), jnp.float32, -bound, bound)
        b_ih = jax.random.uniform(k3, (4 * hidden_size,), jnp.float32, -bound, bound)
        b_hh = jax.random.uniform(k4, (4 * hidden_size,), jnp.float32, -bound, bound)
        layers.append({
            "wih_t": jnp.transpose(w_ih).astype(jnp.bfloat16),   # (in_dim, 4H)
            "whh_t": jnp.transpose(w_hh).astype(jnp.bfloat16),   # (H, 4H)
            "bias": (b_ih + b_hh).reshape(1, 4 * hidden_size),   # fp32
        })
    params["lstm"] = layers
    return params


@jax.jit
def encoder_forward(params, x_ids):
    """x_ids: int32 (T, B). Returns (hidden, cell), each (num_layers, B, H) fp32."""
    T, B = x_ids.shape
    layers = params["lstm"]
    num_layers = len(layers)

    # Pad batch to a multiple of 8 (sublanes); split across 2 cores when each half
    # still has >= 8 rows (v7x megacore), else a single batch block.
    B_pad = _round_up(B, 8)
    n_bsplit = 2 if (B_pad % 16 == 0) else 1
    if B_pad != B:
        x_ids = jnp.pad(x_ids, ((0, 0), (0, B_pad - B)))

    vmem_budget = _vmem_budget_bytes()

    # Layer-0 gate input. Dropout on the embedding is identity (eval mode).
    emb_tbl = params["embedding"]
    wih0_t = layers[0]["wih_t"]
    V, G0 = emb_tbl.shape[0], wih0_t.shape[1]
    if V * G0 <= (1 << 20):
        # Small vocab: gather a pre-projected (V, 4H) table — no (T,B,E) intermediate.
        xg_table = jnp.dot(emb_tbl.astype(jnp.bfloat16), wih0_t,
                           preferred_element_type=jnp.float32).astype(jnp.bfloat16)
        xg = jnp.take(xg_table, x_ids, axis=0)                     # (T, B_pad, 4H) bf16
    else:
        emb = jnp.take(emb_tbl, x_ids, axis=0).astype(jnp.bfloat16)  # (T, B_pad, E)
        xg = jnp.einsum("tbe,eg->tbg", emb, wih0_t,
                        preferred_element_type=jnp.float32).astype(jnp.bfloat16)

    hs, cs = [], []
    for l, lp in enumerate(layers):
        wih_next_t = layers[l + 1]["wih_t"] if l + 1 < num_layers else None
        # inter-layer dropout of nn.LSTM is identity in eval mode.
        xg, h_f, c_f = lstm_layer(xg, lp["bias"], lp["whh_t"], wih_next_t,
                                  n_bsplit=n_bsplit, vmem_budget=vmem_budget)
        hs.append(h_f[:B])
        cs.append(c_f[:B])

    hidden = jnp.stack(hs, axis=0)   # (num_layers, B, H) fp32
    cell = jnp.stack(cs, axis=0)     # (num_layers, B, H) fp32
    return hidden, cell


def _reference_encoder(params, x_ids):
    """Plain-JAX fp32 reference using the same (bf16-cast) weights, for a sanity check."""
    x = jnp.take(params["embedding"], x_ids, axis=0)  # (T, B, E) fp32
    hs, cs = [], []
    for lp in params["lstm"]:
        wih = lp["wih_t"].astype(jnp.float32)
        whh = lp["whh_t"].astype(jnp.float32)
        bias = lp["bias"][0]
        T, B, _ = x.shape
        H = whh.shape[0]
        h = jnp.zeros((B, H), jnp.float32)
        c = jnp.zeros((B, H), jnp.float32)
        outs = []
        for t in range(T):
            g = x[t] @ wih + h @ whh + bias
            i = jax.nn.sigmoid(g[:, :H])
            f = jax.nn.sigmoid(g[:, H:2 * H])
            gg = jnp.tanh(g[:, 2 * H:3 * H])
            o = jax.nn.sigmoid(g[:, 3 * H:])
            c = f * c + i * gg
            h = o * jnp.tanh(c)
            outs.append(h)
        x = jnp.stack(outs, axis=0)
        hs.append(h)
        cs.append(c)
    return jnp.stack(hs, axis=0), jnp.stack(cs, axis=0)


if __name__ == "__main__":
    # Small shapes consistent with the module's forward.
    input_size = 50        # vocab
    embedding_size = 16
    hidden_size = 32
    num_layers = 2
    seq_len = 8
    batch = 4

    key = jax.random.PRNGKey(0)
    key, k_ids = jax.random.split(key)
    x_ids = jax.random.randint(k_ids, (seq_len, batch), 0, input_size, jnp.int32)

    params = init_encoder_params(key, input_size, embedding_size,
                                 hidden_size, num_layers)

    hidden, cell = encoder_forward(params, x_ids)
    jax.block_until_ready((hidden, cell))

    assert hidden.shape == (num_layers, batch, hidden_size)
    assert cell.shape == (num_layers, batch, hidden_size)
    assert hidden.dtype == jnp.float32 and cell.dtype == jnp.float32

    # Loose sanity check vs. fp32 reference (bf16 streaming/weights => small drift).
    h_ref, c_ref = _reference_encoder(params, x_ids)
    err = max(float(jnp.max(jnp.abs(hidden - h_ref))),
              float(jnp.max(jnp.abs(cell - c_ref))))
    assert err < 0.1, f"numerical drift too large: {err}"

    print("KERNEL_OK")
</pallas_src>

<mosaic_0001>
module attributes {stable_mosaic.version = 11 : i64} {
  func.func @_lstm_block_kernel(%arg0: i32, %arg1: i32, %arg2: memref<8x8x128xbf16, #tpu.memory_space<vmem>>, %arg3: memref<1x128xf32, #tpu.memory_space<vmem>>, %arg4: memref<32x128xbf16, #tpu.memory_space<vmem>>, %arg5: memref<8x32xf32, #tpu.memory_space<vmem>>, %arg6: memref<8x32xf32, #tpu.memory_space<vmem>>) attributes {dimension_semantics = [#tpu.dimension_semantics<parallel>, #tpu.dimension_semantics<arbitrary>], iteration_bounds = array<i64: 1, 1>, scalar_prefetch = 0 : i64, scratch_operands = 0 : i64, tpu.core_type = #tpu.core_type<tc>, window_params = [{transform_indices = @transform_0, window_bounds = array<i64: 8, 8, 128>}, {pipeline_mode = #tpu.pipeline_mode<synchronous>, transform_indices = @transform_1, window_bounds = array<i64: 1, 128>}, {pipeline_mode = #tpu.pipeline_mode<synchronous>, transform_indices = @transform_2, window_bounds = array<i64: 32, 128>}, {transform_indices = @transform_3, window_bounds = array<i64: 8, 32>}, {transform_indices = @transform_4, window_bounds = array<i64: 8, 32>}]} {
    %c0_i32 = arith.constant 0 : i32
    %0 = arith.cmpi eq, %arg1, %c0_i32 : i32
    %1 = arith.extui %0 : i1 to i32
    %c0_i32_0 = arith.constant 0 : i32
    %2 = arith.cmpi ne, %1, %c0_i32_0 : i32
    scf.if %2 {
      %cst_60 = arith.constant 0.000000e+00 : f32
      %275 = vector.broadcast %cst_60 : f32 to vector<8x32xf32>
      %c0_61 = arith.constant 0 : index
      %c0_62 = arith.constant 0 : index
      %276 = vector.load %arg5[%c0_61, %c0_62] : memref<8x32xf32, #tpu.memory_space<vmem>>, vector<8x32xf32>
      tpu.vector_store %arg5[%c0_61, %c0_62], %275 {strides = array<i32>} : memref<8x32xf32, #tpu.memory_space<vmem>>, vector<8x32xf32>,
      %cst_63 = arith.constant 0.000000e+00 : f32
      %277 = vector.broadcast %cst_63 : f32 to vector<8x32xf32>
      %c0_64 = arith.constant 0 : index
      %c0_65 = arith.constant 0 : index
      %278 = vector.load %arg6[%c0_64, %c0_65] : memref<8x32xf32, #tpu.memory_space<vmem>>, vector<8x32xf32>
      tpu.vector_store %arg6[%c0_64, %c0_65], %277 {strides = array<i32>} : memref<8x32xf32, #tpu.memory_space<vmem>>, vector<8x32xf32>,
    } else {
    }
    %c0 = arith.constant 0 : index
    %c0_1 = arith.constant 0 : index
    %3 = vector.load %arg4[%c0, %c0_1] : memref<32x128xbf16, #tpu.memory_space<vmem>>, vector<32x128xbf16>
    %c0_2 = arith.constant 0 : index
    %c0_3 = arith.constant 0 : index
    %4 = vector.load %arg3[%c0_2, %c0_3] : memref<1x128xf32, #tpu.memory_space<vmem>>, vector<1x128xf32>
    %5 = vector.shape_cast %4 : vector<1x128xf32> to vector<1x128xf32>
    %6 = vector.broadcast %5 : vector<1x128xf32> to vector<8x128xf32>
    %c0_4 = arith.constant 0 : index
    %c0_5 = arith.constant 0 : index
    %7 = vector.load %arg5[%c0_4, %c0_5] : memref<8x32xf32, #tpu.memory_space<vmem>>, vector<8x32xf32>
    %c0_6 = arith.constant 0 : index
    %c0_7 = arith.constant 0 : index
    %8 = vector.load %arg6[%c0_6, %c0_7] : memref<8x32xf32, #tpu.memory_space<vmem>>, vector<8x32xf32>
    %c0_i32_8 = arith.constant 0 : i32
    %9 = arith.truncf %7 : vector<8x32xf32> to vector<8x32xbf16>
    %cst = arith.constant dense<0.000000e+00> : vector<8x128xf32>
    %10 = tpu.matmul %9, %3, %cst {dimension_numbers = #tpu.dot_dimension_numbers<[1], [0], [0], [1], [0, 0, 1, 1], [], []>} : vector<8x32xbf16>, vector<32x128xbf16>, vector<8x128xf32> -> vector<8x128xf32>
    %11 = arith.index_cast %c0_i32_8 : i32 to index
    %c0_9 = arith.constant 0 : index
    %c0_10 = arith.constant 0 : index
    %12 = vector.load %arg2[%11, %c0_9, %c0_10] : memref<8x8x128xbf16, #tpu.memory_space<vmem>>, vector<1x8x128xbf16>
    %13 = vector.shape_cast %12 : vector<1x8x128xbf16> to vector<8x128xbf16>
    %14 = arith.extf %13 : vector<8x128xbf16> to vector<8x128xf32>
    %15 = arith.addf %10, %14 : vector<8x128xf32>
    %16 = arith.addf %15, %6 : vector<8x128xf32>
    %17 = vector.extract_strided_slice %16 {offsets = [0, 0], sizes = [8, 32], strides = [1, 1]} : vector<8x128xf32> to vector<8x32xf32>
    %18 = arith.negf %17 : vector<8x32xf32>
    %19 = math.exp %18 : vector<8x32xf32>
    %cst_11 = arith.constant 1.000000e+00 : f32
    %20 = vector.broadcast %cst_11 : f32 to vector<8x32xf32>
    %21 = arith.addf %20, %19 : vector<8x32xf32>
    %22 = arith.divf %20, %21 : vector<8x32xf32>
    %23 = vector.extract_strided_slice %16 {offsets = [0, 32], sizes = [8, 32], strides = [1, 1]} : vector<8x128xf32> to vector<8x32xf32>
    %24 = arith.negf %23 : vector<8x32xf32>
    %25 = math.exp %24 : vector<8x32xf32>
    %cst_12 = arith.constant 1.000000e+00 : f32
    %26 = vector.broadcast %cst_12 : f32 to vector<8x32xf32>
    %27 = arith.addf %26, %25 : vector<8x32xf32>
    %28 = arith.divf %26, %27 : vector<8x32xf32>
    %29 = vector.extract_strided_slice %16 {offsets = [0, 64], sizes = [8, 32], strides = [1, 1]} : vector<8x128xf32> to vector<8x32xf32>
    %30 = math.tanh %29 : vector<8x32xf32>
    %31 = vector.extract_strided_slice %16 {offsets = [0, 96], sizes = [8, 32], strides = [1, 1]} : vector<8x128xf32> to vector<8x32xf32>
    %32 = arith.negf %31 : vector<8x32xf32>
    %33 = math.exp %32 : vector<8x32xf32>
    %cst_13 = arith.constant 1.000000e+00 : f32
    %34 = vector.broadcast %cst_13 : f32 to vector<8x32xf32>
    %35 = arith.addf %34, %33 : vector<8x32xf32>
    %36 = arith.divf %34, %35 : vector<8x32xf32>
    %37 = arith.mulf %28, %8 : vector<8x32xf32>
    %38 = arith.mulf %22, %30 : vector<8x32xf32>
    %39 = arith.addf %37, %38 : vector<8x32xf32>
    %40 = math.tanh %39 : vector<8x32xf32>
    %41 = arith.mulf %36, %40 : vector<8x32xf32>
    %c1_i32 = arith.constant 1 : i32
    %42 = arith.truncf %41 : vector<8x32xf32> to vector<8x32xbf16>
    %cst_14 = arith.constant dense<0.000000e+00> : vector<8x128xf32>
    %43 = tpu.matmul %42, %3, %cst_14 {dimension_numbers = #tpu.dot_dimension_numbers<[1], [0], [0], [1], [0, 0, 1, 1], [], []>} : vector<8x32xbf16>, vector<32x128xbf16>, vector<8x128xf32> -> vector<8x128xf32>
    %44 = arith.index_cast %c1_i32 : i32 to index
    %c0_15 = arith.constant 0 : index
    %c0_16 = arith.constant 0 : index
    %45 = vector.load %arg2[%44, %c0_15, %c0_16] : memref<8x8x128xbf16, #tpu.memory_space<vmem>>, vector<1x8x128xbf16>
    %46 = vector.shape_cast %45 : vector<1x8x128xbf16> to vector<8x128xbf16>
    %47 = arith.extf %46 : vector<8x128xbf16> to vector<8x128xf32>
    %48 = arith.addf %43, %47 : vector<8x128xf32>
    %49 = arith.addf %48, %6 : vector<8x128xf32>
    %50 = vector.extract_strided_slice %49 {offsets = [0, 0], sizes = [8, 32], strides = [1, 1]} : vector<8x128xf32> to vector<8x32xf32>
    %51 = arith.negf %50 : vector<8x32xf32>
    %52 = math.exp %51 : vector<8x32xf32>
    %cst_17 = arith.constant 1.000000e+00 : f32
    %53 = vector.broadcast %cst_17 : f32 to vector<8x32xf32>
    %54 = arith.addf %53, %52 : vector<8x32xf32>
    %55 = arith.divf %53, %54 : vector<8x32xf32>
    %56 = vector.extract_strided_slice %49 {offsets = [0, 32], sizes = [8, 32], strides = [1, 1]} : vector<8x128xf32> to vector<8x32xf32>
    %57 = arith.negf %56 : vector<8x32xf32>
    %58 = math.exp %57 : vector<8x32xf32>
    %cst_18 = arith.constant 1.000000e+00 : f32
    %59 = vector.broadcast %cst_18 : f32 to vector<8x32xf32>
    %60 = arith.addf %59, %58 : vector<8x32xf32>
    %61 = arith.divf %59, %60 : vector<8x32xf32>
    %62 = vector.extract_strided_slice %49 {offsets = [0, 64], sizes = [8, 32], strides = [1, 1]} : vector<8x128xf32> to vector<8x32xf32>
    %63 = math.tanh %62 : vector<8x32xf32>
    %64 = vector.extract_strided_slice %49 {offsets = [0, 96], sizes = [8, 32], strides = [1, 1]} : vector<8x128xf32> to vector<8x32xf32>
    %65 = arith.negf %64 : vector<8x32xf32>
    %66 = math.exp %65 : vector<8x32xf32>
    %cst_19 = arith.constant 1.000000e+00 : f32
    %67 = vector.broadcast %cst_19 : f32 to vector<8x32xf32>
    %68 = arith.addf %67, %66 : vector<8x32xf32>
    %69 = arith.divf %67, %68 : vector<8x32xf32>
    %70 = arith.mulf %61, %39 : vector<8x32xf32>
    %71 = arith.mulf %55, %63 : vector<8x32xf32>
    %72 = arith.addf %70, %71 : vector<8x32xf32>
    %73 = math.tanh %72 : vector<8x32xf32>
    %74 = arith.mulf %69, %73 : vector<8x32xf32>
    %c2_i32 = arith.constant 2 : i32
    %75 = arith.truncf %74 : vector<8x32xf32> to vector<8x32xbf16>
    %cst_20 = arith.constant dense<0.000000e+00> : vector<8x128xf32>
    %76 = tpu.matmul %75, %3, %cst_20 {dimension_numbers = #tpu.dot_dimension_numbers<[1], [0], [0], [1], [0, 0, 1, 1], [], []>} : vector<8x32xbf16>, vector<32x128xbf16>, vector<8x128xf32> -> vector<8x128xf32>
    %77 = arith.index_cast %c2_i32 : i32 to index
    %c0_21 = arith.constant 0 : index
    %c0_22 = arith.constant 0 : index
    %78 = vector.load %arg2[%77, %c0_21, %c0_22] : memref<8x8x128xbf16, #tpu.memory_space<vmem>>, vector<1x8x128xbf16>
    %79 = vector.shape_cast %78 : vector<1x8x128xbf16> to vector<8x128xbf16>
    %80 = arith.extf %79 : vector<8x128xbf16> to vector<8x128xf32>
    %81 = arith.addf %76, %80 : vector<8x128xf32>
    %82 = arith.addf %81, %6 : vector<8x128xf32>
    %83 = vector.extract_strided_slice %82 {offsets = [0, 0], sizes = [8, 32], strides = [1, 1]} : vector<8x128xf32> to vector<8x32xf32>
    %84 = arith.negf %83 : vector<8x32xf32>
    %85 = math.exp %84 : vector<8x32xf32>
    %cst_23 = arith.constant 1.000000e+00 : f32
    %86 = vector.broadcast %cst_23 : f32 to vector<8x32xf32>
    %87 = arith.addf %86, %85 : vector<8x32xf32>
    %88 = arith.divf %86, %87 : vector<8x32xf32>
    %89 = vector.extract_strided_slice %82 {offsets = [0, 32], sizes = [8, 32], strides = [1, 1]} : vector<8x128xf32> to vector<8x32xf32>
    %90 = arith.negf %89 : vector<8x32xf32>
    %91 = math.exp %90 : vector<8x32xf32>
    %cst_24 = arith.constant 1.000000e+00 : f32
    %92 = vector.broadcast %cst_24 : f32 to vector<8x32xf32>
    %93 = arith.addf %92, %91 : vector<8x32xf32>
    %94 = arith.divf %92, %93 : vector<8x32xf32>
    %95 = vector.extract_strided_slice %82 {offsets = [0, 64], sizes = [8, 32], strides = [1, 1]} : vector<8x128xf32> to vector<8x32xf32>
    %96 = math.tanh %95 : vector<8x32xf32>
    %97 = vector.extract_strided_slice %82 {offsets = [0, 96], sizes = [8, 32], strides = [1, 1]} : vector<8x128xf32> to vector<8x32xf32>
    %98 = arith.negf %97 : vector<8x32xf32>
    %99 = math.exp %98 : vector<8x32xf32>
    %cst_25 = arith.constant 1.000000e+00 : f32
    %100 = vector.broadcast %cst_25 : f32 to vector<8x32xf32>
    %101 = arith.addf %100, %99 : vector<8x32xf32>
    %102 = arith.divf %100, %101 : vector<8x32xf32>
    %103 = arith.mulf %94, %72 : vector<8x32xf32>
    %104 = arith.mulf %88, %96 : vector<8x32xf32>
    %105 = arith.addf %103, %104 : vector<8x32xf32>
    %106 = math.tanh %105 : vector<8x32xf32>
    %107 = arith.mulf %102, %106 : vector<8x32xf32>
    %c3_i32 = arith.constant 3 : i32
    %108 = arith.truncf %107 : vector<8x32xf32> to vector<8x32xbf16>
    %cst_26 = arith.constant dense<0.000000e+00> : vector<8x128xf32>
    %109 = tpu.matmul %108, %3, %cst_26 {dimension_numbers = #tpu.dot_dimension_numbers<[1], [0], [0], [1], [0, 0, 1, 1], [], []>} : vector<8x32xbf16>, vector<32x128xbf16>, vector<8x128xf32> -> vector<8x128xf32>
    %110 = arith.index_cast %c3_i32 : i32 to index
    %c0_27 = arith.constant 0 : index
    %c0_28 = arith.constant 0 : index
    %111 = vector.load %arg2[%110, %c0_27, %c0_28] : memref<8x8x128xbf16, #tpu.memory_space<vmem>>, vector<1x8x128xbf16>
    %112 = vector.shape_cast %111 : vector<1x8x128xbf16> to vector<8x128xbf16>
    %113 = arith.extf %112 : vector<8x128xbf16> to vector<8x128xf32>
    %114 = arith.addf %109, %113 : vector<8x128xf32>
    %115 = arith.addf %114, %6 : vector<8x128xf32>
    %116 = vector.extract_strided_slice %115 {offsets = [0, 0], sizes = [8, 32], strides = [1, 1]} : vector<8x128xf32> to vector<8x32xf32>
    %117 = arith.negf %116 : vector<8x32xf32>
    %118 = math.exp %117 : vector<8x32xf32>
    %cst_29 = arith.constant 1.000000e+00 : f32
    %119 = vector.broadcast %cst_29 : f32 to vector<8x32xf32>
    %120 = arith.addf %119, %118 : vector<8x32xf32>
    %121 = arith.divf %119, %120 : vector<8x32xf32>
    %122 = vector.extract_strided_slice %115 {offsets = [0, 32], sizes = [8, 32], strides = [1, 1]} : vector<8x128xf32> to vector<8x32xf32>
    %123 = arith.negf %122 : vector<8x32xf32>
    %124 = math.exp %123 : vector<8x32xf32>
    %cst_30 = arith.constant 1.000000e+00 : f32
    %125 = vector.broadcast %cst_30 : f32 to vector<8x32xf32>
    %126 = arith.addf %125, %124 : vector<8x32xf32>
    %127 = arith.divf %125, %126 : vector<8x32xf32>
    %128 = vector.extract_strided_slice %115 {offsets = [0, 64], sizes = [8, 32], strides = [1, 1]} : vector<8x128xf32> to vector<8x32xf32>
    %129 = math.tanh %128 : vector<8x32xf32>
    %130 = vector.extract_strided_slice %115 {offsets = [0, 96], sizes = [8, 32], strides = [1, 1]} : vector<8x128xf32> to vector<8x32xf32>
    %131 = arith.negf %130 : vector<8x32xf32>
    %132 = math.exp %131 : vector<8x32xf32>
    %cst_31 = arith.constant 1.000000e+00 : f32
    %133 = vector.broadcast %cst_31 : f32 to vector<8x32xf32>
    %134 = arith.addf %133, %132 : vector<8x32xf32>
    %135 = arith.divf %133, %134 : vector<8x32xf32>
    %136 = arith.mulf %127, %105 : vector<8x32xf32>
    %137 = arith.mulf %121, %129 : vector<8x32xf32>
    %138 = arith.addf %136, %137 : vector<8x32xf32>
    %139 = math.tanh %138 : vector<8x32xf32>
    %140 = arith.mulf %135, %139 : vector<8x32xf32>
    %c4_i32 = arith.constant 4 : i32
    %141 = arith.truncf %140 : vector<8x32xf32> to vector<8x32xbf16>
    %cst_32 = arith.constant dense<0.000000e+00> : vector<8x128xf32>
    %142 = tpu.matmul %141, %3, %cst_32 {dimension_numbers = #tpu.dot_dimension_numbers<[1], [0], [0], [1], [0, 0, 1, 1], [], []>} : vector<8x32xbf16>, vector<32x128xbf16>, vector<8x128xf32> -> vector<8x128xf32>
    %143 = arith.index_cast %c4_i32 : i32 to index
    %c0_33 = arith.constant 0 : index
    %c0_34 = arith.constant 0 : index
    %144 = vector.load %arg2[%143, %c0_33, %c0_34] : memref<8x8x128xbf16, #tpu.memory_space<vmem>>, vector<1x8x128xbf16>
    %145 = vector.shape_cast %144 : vector<1x8x128xbf16> to vector<8x128xbf16>
    %146 = arith.extf %145 : vector<8x128xbf16> to vector<8x128xf32>
    %147 = arith.addf %142, %146 : vector<8x128xf32>
    %148 = arith.addf %147, %6 : vector<8x128xf32>
    %149 = vector.extract_strided_slice %148 {offsets = [0, 0], sizes = [8, 32], strides = [1, 1]} : vector<8x128xf32> to vector<8x32xf32>
    %150 = arith.negf %149 : vector<8x32xf32>
    %151 = math.exp %150 : vector<8x32xf32>
    %cst_35 = arith.constant 1.000000e+00 : f32
    %152 = vector.broadcast %cst_35 : f32 to vector<8x32xf32>
    %153 = arith.addf %152, %151 : vector<8x32xf32>
    %154 = arith.divf %152, %153 : vector<8x32xf32>
    %155 = vector.extract_strided_slice %148 {offsets = [0, 32], sizes = [8, 32], strides = [1, 1]} : vector<8x128xf32> to vector<8x32xf32>
    %156 = arith.negf %155 : vector<8x32xf32>
    %157 = math.exp %156 : vector<8x32xf32>
    %cst_36 = arith.constant 1.000000e+00 : f32
    %158 = vector.broadcast %cst_36 : f32 to vector<8x32xf32>
    %159 = arith.addf %158, %157 : vector<8x32xf32>
    %160 = arith.divf %158, %159 : vector<8x32xf32>
    %161 = vector.extract_strided_slice %148 {offsets = [0, 64], sizes = [8, 32], strides = [1, 1]} : vector<8x128xf32> to vector<8x32xf32>
    %162 = math.tanh %161 : vector<8x32xf32>
    %163 = vector.extract_strided_slice %148 {offsets = [0, 96], sizes = [8, 32], strides = [1, 1]} : vector<8x128xf32> to vector<8x32xf32>
    %164 = arith.negf %163 : vector<8x32xf32>
    %165 = math.exp %164 : vector<8x32xf32>
    %cst_37 = arith.constant 1.000000e+00 : f32
    %166 = vector.broadcast %cst_37 : f32 to vector<8x32xf32>
    %167 = arith.addf %166, %165 : vector<8x32xf32>
    %168 = arith.divf %166, %167 : vector<8x32xf32>
    %169 = arith.mulf %160, %138 : vector<8x32xf32>
    %170 = arith.mulf %154, %162 : vector<8x32xf32>
    %171 = arith.addf %169, %170 : vector<8x32xf32>
    %172 = math.tanh %171 : vector<8x32xf32>
    %173 = arith.mulf %168, %172 : vector<8x32xf32>
    %c5_i32 = arith.constant 5 : i32
    %174 = arith.truncf %173 : vector<8x32xf32> to vector<8x32xbf16>
    %cst_38 = arith.constant dense<0.000000e+00> : vector<8x128xf32>
    %175 = tpu.matmul %174, %3, %cst_38 {dimension_numbers = #tpu.dot_dimension_numbers<[1], [0], [0], [1], [0, 0, 1, 1], [], []>} : vector<8x32xbf16>, vector<32x128xbf16>, vector<8x128xf32> -> vector<8x128xf32>
    %176 = arith.index_cast %c5_i32 : i32 to index
    %c0_39 = arith.constant 0 : index
    %c0_40 = arith.constant 0 : index
    %177 = vector.load %arg2[%176, %c0_39, %c0_40] : memref<8x8x128xbf16, #tpu.memory_space<vmem>>, vector<1x8x128xbf16>
    %178 = vector.shape_cast %177 : vector<1x8x128xbf16> to vector<8x128xbf16>
    %179 = arith.extf %178 : vector<8x128xbf16> to vector<8x128xf32>
    %180 = arith.addf %175, %179 : vector<8x128xf32>
    %181 = arith.addf %180, %6 : vector<8x128xf32>
    %182 = vector.extract_strided_slice %181 {offsets = [0, 0], sizes = [8, 32], strides = [1, 1]} : vector<8x128xf32> to vector<8x32xf32>
    %183 = arith.negf %182 : vector<8x32xf32>
    %184 = math.exp %183 : vector<8x32xf32>
    %cst_41 = arith.constant 1.000000e+00 : f32
    %185 = vector.broadcast %cst_41 : f32 to vector<8x32xf32>
    %186 = arith.addf %185, %184 : vector<8x32xf32>
    %187 = arith.divf %185, %186 : vector<8x32xf32>
    %188 = vector.extract_strided_slice %181 {offsets = [0, 32], sizes = [8, 32], strides = [1, 1]} : vector<8x128xf32> to vector<8x32xf32>
    %189 = arith.negf %188 : vector<8x32xf32>
    %190 = math.exp %189 : vector<8x32xf32>
    %cst_42 = arith.constant 1.000000e+00 : f32
    %191 = vector.broadcast %cst_42 : f32 to vector<8x32xf32>
    %192 = arith.addf %191, %190 : vector<8x32xf32>
    %193 = arith.divf %191, %192 : vector<8x32xf32>
    %194 = vector.extract_strided_slice %181 {offsets = [0, 64], sizes = [8, 32], strides = [1, 1]} : vector<8x128xf32> to vector<8x32xf32>
    %195 = math.tanh %194 : vector<8x32xf32>
    %196 = vector.extract_strided_slice %181 {offsets = [0, 96], sizes = [8, 32], strides = [1, 1]} : vector<8x128xf32> to vector<8x32xf32>
    %197 = arith.negf %196 : vector<8x32xf32>
    %198 = math.exp %197 : vector<8x32xf32>
    %cst_43 = arith.constant 1.000000e+00 : f32
    %199 = vector.broadcast %cst_43 : f32 to vector<8x32xf32>
    %200 = arith.addf %199, %198 : vector<8x32xf32>
    %201 = arith.divf %199, %200 : vector<8x32xf32>
    %202 = arith.mulf %193, %171 : vector<8x32xf32>
    %203 = arith.mulf %187, %195 : vector<8x32xf32>
    %204 = arith.addf %202, %203 : vector<8x32xf32>
    %205 = math.tanh %204 : vector<8x32xf32>
    %206 = arith.mulf %201, %205 : vector<8x32xf32>
    %c6_i32 = arith.constant 6 : i32
    %207 = arith.truncf %206 : vector<8x32xf32> to vector<8x32xbf16>
    %cst_44 = arith.constant dense<0.000000e+00> : vector<8x128xf32>
    %208 = tpu.matmul %207, %3, %cst_44 {dimension_numbers = #tpu.dot_dimension_numbers<[1], [0], [0], [1], [0, 0, 1, 1], [], []>} : vector<8x32xbf16>, vector<32x128xbf16>, vector<8x128xf32> -> vector<8x128xf32>
    %209 = arith.index_cast %c6_i32 : i32 to index
    %c0_45 = arith.constant 0 : index
    %c0_46 = arith.constant 0 : index
    %210 = vector.load %arg2[%209, %c0_45, %c0_46] : memref<8x8x128xbf16, #tpu.memory_space<vmem>>, vector<1x8x128xbf16>
    %211 = vector.shape_cast %210 : vector<1x8x128xbf16> to vector<8x128xbf16>
    %212 = arith.extf %211 : vector<8x128xbf16> to vector<8x128xf32>
    %213 = arith.addf %208, %212 : vector<8x128xf32>
    %214 = arith.addf %213, %6 : vector<8x128xf32>
    %215 = vector.extract_strided_slice %214 {offsets = [0, 0], sizes = [8, 32], strides = [1, 1]} : vector<8x128xf32> to vector<8x32xf32>
    %216 = arith.negf %215 : vector<8x32xf32>
    %217 = math.exp %216 : vector<8x32xf32>
    %cst_47 = arith.constant 1.000000e+00 : f32
    %218 = vector.broadcast %cst_47 : f32 to vector<8x32xf32>
    %219 = arith.addf %218, %217 : vector<8x32xf32>
    %220 = arith.divf %218, %219 : vector<8x32xf32>
    %221 = vector.extract_strided_slice %214 {offsets = [0, 32], sizes = [8, 32], strides = [1, 1]} : vector<8x128xf32> to vector<8x32xf32>
    %222 = arith.negf %221 : vector<8x32xf32>
    %223 = math.exp %222 : vector<8x32xf32>
    %cst_48 = arith.constant 1.000000e+00 : f32
    %224 = vector.broadcast %cst_48 : f32 to vector<8x32xf32>
    %225 = arith.addf %224, %223 : vector<8x32xf32>
    %226 = arith.divf %224, %225 : vector<8x32xf32>
    %227 = vector.extract_strided_slice %214 {offsets = [0, 64], sizes = [8, 32], strides = [1, 1]} : vector<8x128xf32> to vector<8x32xf32>
    %228 = math.tanh %227 : vector<8x32xf32>
    %229 = vector.extract_strided_slice %214 {offsets = [0, 96], sizes = [8, 32], strides = [1, 1]} : vector<8x128xf32> to vector<8x32xf32>
    %230 = arith.negf %229 : vector<8x32xf32>
    %231 = math.exp %230 : vector<8x32xf32>
    %cst_49 = arith.constant 1.000000e+00 : f32
    %232 = vector.broadcast %cst_49 : f32 to vector<8x32xf32>
    %233 = arith.addf %232, %231 : vector<8x32xf32>
    %234 = arith.divf %232, %233 : vector<8x32xf32>
    %235 = arith.mulf %226, %204 : vector<8x32xf32>
    %236 = arith.mulf %220, %228 : vector<8x32xf32>
    %237 = arith.addf %235, %236 : vector<8x32xf32>
    %238 = math.tanh %237 : vector<8x32xf32>
    %239 = arith.mulf %234, %238 : vector<8x32xf32>
    %c7_i32 = arith.constant 7 : i32
    %240 = arith.truncf %239 : vector<8x32xf32> to vector<8x32xbf16>
    %cst_50 = arith.constant dense<0.000000e+00> : vector<8x128xf32>
    %241 = tpu.matmul %240, %3, %cst_50 {dimension_numbers = #tpu.dot_dimension_numbers<[1], [0], [0], [1], [0, 0, 1, 1], [], []>} : vector<8x32xbf16>, vector<32x128xbf16>, vector<8x128xf32> -> vector<8x128xf32>
    %242 = arith.index_cast %c7_i32 : i32 to index
    %c0_51 = arith.constant 0 : index
    %c0_52 = arith.constant 0 : index
    %243 = vector.load %arg2[%242, %c0_51, %c0_52] : memref<8x8x128xbf16, #tpu.memory_space<vmem>>, vector<1x8x128xbf16>
    %244 = vector.shape_cast %243 : vector<1x8x128xbf16> to vector<8x128xbf16>
    %245 = arith.extf %244 : vector<8x128xbf16> to vector<8x128xf32>
    %246 = arith.addf %241, %245 : vector<8x128xf32>
    %247 = arith.addf %246, %6 : vector<8x128xf32>
    %248 = vector.extract_strided_slice %247 {offsets = [0, 0], sizes = [8, 32], strides = [1, 1]} : vector<8x128xf32> to vector<8x32xf32>
    %249 = arith.negf %248 : vector<8x32xf32>
    %250 = math.exp %249 : vector<8x32xf32>
    %cst_53 = arith.constant 1.000000e+00 : f32
    %251 = vector.broadcast %cst_53 : f32 to vector<8x32xf32>
    %252 = arith.addf %251, %250 : vector<8x32xf32>
    %253 = arith.divf %251, %252 : vector<8x32xf32>
    %254 = vector.extract_strided_slice %247 {offsets = [0, 32], sizes = [8, 32], strides = [1, 1]} : vector<8x128xf32> to vector<8x32xf32>
    %255 = arith.negf %254 : vector<8x32xf32>
    %256 = math.exp %255 : vector<8x32xf32>
    %cst_54 = arith.constant 1.000000e+00 : f32
    %257 = vector.broadcast %cst_54 : f32 to vector<8x32xf32>
    %258 = arith.addf %257, %256 : vector<8x32xf32>
    %259 = arith.divf %257, %258 : vector<8x32xf32>
    %260 = vector.extract_strided_slice %247 {offsets = [0, 64], sizes = [8, 32], strides = [1, 1]} : vector<8x128xf32> to vector<8x32xf32>
    %261 = math.tanh %260 : vector<8x32xf32>
    %262 = vector.extract_strided_slice %247 {offsets = [0, 96], sizes = [8, 32], strides = [1, 1]} : vector<8x128xf32> to vector<8x32xf32>
    %263 = arith.negf %262 : vector<8x32xf32>
    %264 = math.exp %263 : vector<8x32xf32>
    %cst_55 = arith.constant 1.000000e+00 : f32
    %265 = vector.broadcast %cst_55 : f32 to vector<8x32xf32>
    %266 = arith.addf %265, %264 : vector<8x32xf32>
    %267 = arith.divf %265, %266 : vector<8x32xf32>
    %268 = arith.mulf %259, %237 : vector<8x32xf32>
    %269 = arith.mulf %253, %261 : vector<8x32xf32>
    %270 = arith.addf %268, %269 : vector<8x32xf32>
    %271 = math.tanh %270 : vector<8x32xf32>
    %272 = arith.mulf %267, %271 : vector<8x32xf32>
    %c8_i32 = arith.constant 8 : i32
    %c0_56 = arith.constant 0 : index
    %c0_57 = arith.constant 0 : index
    %273 = vector.load %arg5[%c0_56, %c0_57] : memref<8x32xf32, #tpu.memory_space<vmem>>, vector<8x32xf32>
    tpu.vector_store %arg5[%c0_56, %c0_57], %272 {strides = array<i32>} : memref<8x32xf32, #tpu.memory_space<vmem>>, vector<8x32xf32>,
    %c0_58 = arith.constant 0 : index
    %c0_59 = arith.constant 0 : index
    %274 = vector.load %arg6[%c0_58, %c0_59] : memref<8x32xf32, #tpu.memory_space<vmem>>, vector<8x32xf32>
    tpu.vector_store %arg6[%c0_58, %c0_59], %270 {strides = array<i32>} : memref<8x32xf32, #tpu.memory_space<vmem>>, vector<8x32xf32>,
    return
  }
  func.func @transform_0(%arg0: i32, %arg1: i32) -> (i32, i32, i32) {
    %c0_i32 = arith.constant 0 : i32
    %c0_i32_0 = arith.constant 0 : i32
    return %arg1, %arg0, %c0_i32 : i32, i32, i32
  }
  func.func @transform_1(%arg0: i32, %arg1: i32) -> (i32, i32) {
    %c0_i32 = arith.constant 0 : i32
    %c0_i32_0 = arith.constant 0 : i32
    %c0_i32_1 = arith.constant 0 : i32
    return %c0_i32, %c0_i32_0 : i32, i32
  }
  func.func @transform_2(%arg0: i32, %arg1: i32) -> (i32, i32) {
    %c0_i32 = arith.constant 0 : i32
    %c0_i32_0 = arith.constant 0 : i32
    %c0_i32_1 = arith.constant 0 : i32
    return %c0_i32, %c0_i32_0 : i32, i32
  }
  func.func @transform_3(%arg0: i32, %arg1: i32) -> (i32, i32) {
    %c0_i32 = arith.constant 0 : i32
    %c0_i32_0 = arith.constant 0 : i32
    return %arg0, %c0_i32 : i32, i32
  }
  func.func @transform_4(%arg0: i32, %arg1: i32) -> (i32, i32) {
    %c0_i32 = arith.constant 0 : i32
    %c0_i32_0 = arith.constant 0 : i32
    return %arg0, %c0_i32 : i32, i32
  }
}

module attributes {stable_mosaic.version = 11 : i64} {
  func.func @_lstm_block_kernel(%arg0: i32, %arg1: i32, %arg2: memref<8x8x128xbf16, #tpu.memory_space<vmem>>, %arg3: memref<1x128xf32, #tpu.memory_space<vmem>>, %arg4: memref<32x128xbf16, #tpu.memory_space<vmem>>, %arg5: memref<32x128xbf16, #tpu.memory_space<vmem>>, %arg6: memref<8x8x128xbf16, #tpu.memory_space<vmem>>, %arg7: memref<8x32xf32, #tpu.memory_space<vmem>>, %arg8: memref<8x32xf32, #tpu.memory_space<vmem>>) attributes {dimension_semantics = [#tpu.dimension_semantics<parallel>, #tpu.dimension_semantics<arbitrary>], iteration_bounds = array<i64: 1, 1>, scalar_prefetch = 0 : i64, scratch_operands = 0 : i64, tpu.core_type = #tpu.core_type<tc>, window_params = [{transform_indices = @transform_0, window_bounds = array<i64: 8, 8, 128>}, {pipeline_mode = #tpu.pipeline_mode<synchronous>, transform_indices = @transform_1, window_bounds = array<i64: 1, 128>}, {pipeline_mode = #tpu.pipeline_mode<synchronous>, transform_indices = @transform_2, window_bounds = array<i64: 32, 128>}, {pipeline_mode = #tpu.pipeline_mode<synchronous>, transform_indices = @transform_3, window_bounds = array<i64: 32, 128>}, {transform_indices = @transform_4, window_bounds = array<i64: 8, 8, 128>}, {transform_indices = @transform_5, window_bounds = array<i64: 8, 32>}, {transform_indices = @transform_6, window_bounds = array<i64: 8, 32>}]} {
    %c0_i32 = arith.constant 0 : i32
    %0 = arith.cmpi eq, %arg1, %c0_i32 : i32
    %1 = arith.extui %0 : i1 to i32
    %c0_i32_0 = arith.constant 0 : i32
    %2 = arith.cmpi ne, %1, %c0_i32_0 : i32
    scf.if %2 {
      %cst_86 = arith.constant 0.000000e+00 : f32
      %332 = vector.broadcast %cst_86 : f32 to vector<8x32xf32>
      %c0_87 = arith.constant 0 : index
      %c0_88 = arith.constant 0 : index
      %333 = vector.load %arg7[%c0_87, %c0_88] : memref<8x32xf32, #tpu.memory_space<vmem>>, vector<8x32xf32>
      tpu.vector_store %arg7[%c0_87, %c0_88], %332 {strides = array<i32>} : memref<8x32xf32, #tpu.memory_space<vmem>>, vector<8x32xf32>,
      %cst_89 = arith.constant 0.000000e+00 : f32
      %334 = vector.broadcast %cst_89 : f32 to vector<8x32xf32>
      %c0_90 = arith.constant 0 : index
      %c0_91 = arith.constant 0 : index
      %335 = vector.load %arg8[%c0_90, %c0_91] : memref<8x32xf32, #tpu.memory_space<vmem>>, vector<8x32xf32>
      tpu.vector_store %arg8[%c0_90, %c0_91], %334 {strides = array<i32>} : memref<8x32xf32, #tpu.memory_space<vmem>>, vector<8x32xf32>,
    } else {
    }
    %c0 = arith.constant 0 : index
    %c0_1 = arith.constant 0 : index
    %3 = vector.load %arg4[%c0, %c0_1] : memref<32x128xbf16, #tpu.memory_space<vmem>>, vector<32x128xbf16>
    %c0_2 = arith.constant 0 : index
    %c0_3 = arith.constant 0 : index
    %4 = vector.load %arg3[%c0_2, %c0_3] : memref<1x128xf32, #tpu.memory_space<vmem>>, vector<1x128xf32>
    %5 = vector.shape_cast %4 : vector<1x128xf32> to vector<1x128xf32>
    %6 = vector.broadcast %5 : vector<1x128xf32> to vector<8x128xf32>
    %c0_4 = arith.constant 0 : index
    %c0_5 = arith.constant 0 : index
    %7 = vector.load %arg5[%c0_4, %c0_5] : memref<32x128xbf16, #tpu.memory_space<vmem>>, vector<32x128xbf16>
    %c0_6 = arith.constant 0 : index
    %c0_7 = arith.constant 0 : index
    %8 = vector.load %arg7[%c0_6, %c0_7] : memref<8x32xf32, #tpu.memory_space<vmem>>, vector<8x32xf32>
    %c0_8 = arith.constant 0 : index
    %c0_9 = arith.constant 0 : index
    %9 = vector.load %arg8[%c0_8, %c0_9] : memref<8x32xf32, #tpu.memory_space<vmem>>, vector<8x32xf32>
    %c0_i32_10 = arith.constant 0 : i32
    %10 = arith.truncf %8 : vector<8x32xf32> to vector<8x32xbf16>
    %cst = arith.constant dense<0.000000e+00> : vector<8x128xf32>
    %11 = tpu.matmul %10, %3, %cst {dimension_numbers = #tpu.dot_dimension_numbers<[1], [0], [0], [1], [0, 0, 1, 1], [], []>} : vector<8x32xbf16>, vector<32x128xbf16>, vector<8x128xf32> -> vector<8x128xf32>
    %12 = arith.index_cast %c0_i32_10 : i32 to index
    %c0_11 = arith.constant 0 : index
    %c0_12 = arith.constant 0 : index
    %13 = vector.load %arg2[%12, %c0_11, %c0_12] : memref<8x8x128xbf16, #tpu.memory_space<vmem>>, vector<1x8x128xbf16>
    %14 = vector.shape_cast %13 : vector<1x8x128xbf16> to vector<8x128xbf16>
    %15 = arith.extf %14 : vector<8x128xbf16> to vector<8x128xf32>
    %16 = arith.addf %11, %15 : vector<8x128xf32>
    %17 = arith.addf %16, %6 : vector<8x128xf32>
    %18 = vector.extract_strided_slice %17 {offsets = [0, 0], sizes = [8, 32], strides = [1, 1]} : vector<8x128xf32> to vector<8x32xf32>
    %19 = arith.negf %18 : vector<8x32xf32>
    %20 = math.exp %19 : vector<8x32xf32>
    %cst_13 = arith.constant 1.000000e+00 : f32
    %21 = vector.broadcast %cst_13 : f32 to vector<8x32xf32>
    %22 = arith.addf %21, %20 : vector<8x32xf32>
    %23 = arith.divf %21, %22 : vector<8x32xf32>
    %24 = vector.extract_strided_slice %17 {offsets = [0, 32], sizes = [8, 32], strides = [1, 1]} : vector<8x128xf32> to vector<8x32xf32>
    %25 = arith.negf %24 : vector<8x32xf32>
    %26 = math.exp %25 : vector<8x32xf32>
    %cst_14 = arith.constant 1.000000e+00 : f32
    %27 = vector.broadcast %cst_14 : f32 to vector<8x32xf32>
    %28 = arith.addf %27, %26 : vector<8x32xf32>
    %29 = arith.divf %27, %28 : vector<8x32xf32>
    %30 = vector.extract_strided_slice %17 {offsets = [0, 64], sizes = [8, 32], strides = [1, 1]} : vector<8x128xf32> to vector<8x32xf32>
    %31 = math.tanh %30 : vector<8x32xf32>
    %32 = vector.extract_strided_slice %17 {offsets = [0, 96], sizes = [8, 32], strides = [1, 1]} : vector<8x128xf32> to vector<8x32xf32>
    %33 = arith.negf %32 : vector<8x32xf32>
    %34 = math.exp %33 : vector<8x32xf32>
    %cst_15 = arith.constant 1.000000e+00 : f32
    %35 = vector.broadcast %cst_15 : f32 to vector<8x32xf32>
    %36 = arith.addf %35, %34 : vector<8x32xf32>
    %37 = arith.divf %35, %36 : vector<8x32xf32>
    %38 = arith.mulf %29, %9 : vector<8x32xf32>
    %39 = arith.mulf %23, %31 : vector<8x32xf32>
    %40 = arith.addf %38, %39 : vector<8x32xf32>
    %41 = math.tanh %40 : vector<8x32xf32>
    %42 = arith.mulf %37, %41 : vector<8x32xf32>
    %43 = arith.truncf %42 : vector<8x32xf32> to vector<8x32xbf16>
    %cst_16 = arith.constant dense<0.000000e+00> : vector<8x128xf32>
    %44 = tpu.matmul %43, %7, %cst_16 {dimension_numbers = #tpu.dot_dimension_numbers<[1], [0], [0], [1], [0, 0, 1, 1], [], []>} : vector<8x32xbf16>, vector<32x128xbf16>, vector<8x128xf32> -> vector<8x128xf32>
    %45 = arith.truncf %44 : vector<8x128xf32> to vector<8x128xbf16>
    %46 = arith.index_cast %c0_i32_10 : i32 to index
    %c0_17 = arith.constant 0 : index
    %c0_18 = arith.constant 0 : index
    %47 = vector.load %arg6[%46, %c0_17, %c0_18] : memref<8x8x128xbf16, #tpu.memory_space<vmem>>, vector<1x8x128xbf16>
    %48 = vector.shape_cast %47 : vector<1x8x128xbf16> to vector<8x128xbf16>
    %49 = vector.shape_cast %45 : vector<8x128xbf16> to vector<1x8x128xbf16>
    tpu.vector_store %arg6[%46, %c0_17, %c0_18], %49 {strides = array<i32>} : memref<8x8x128xbf16, #tpu.memory_space<vmem>>, vector<1x8x128xbf16>,
    %c1_i32 = arith.constant 1 : i32
    %50 = arith.truncf %42 : vector<8x32xf32> to vector<8x32xbf16>
    %cst_19 = arith.constant dense<0.000000e+00> : vector<8x128xf32>
    %51 = tpu.matmul %50, %3, %cst_19 {dimension_numbers = #tpu.dot_dimension_numbers<[1], [0], [0], [1], [0, 0, 1, 1], [], []>} : vector<8x32xbf16>, vector<32x128xbf16>, vector<8x128xf32> -> vector<8x128xf32>
    %52 = arith.index_cast %c1_i32 : i32 to index
    %c0_20 = arith.constant 0 : index
    %c0_21 = arith.constant 0 : index
    %53 = vector.load %arg2[%52, %c0_20, %c0_21] : memref<8x8x128xbf16, #tpu.memory_space<vmem>>, vector<1x8x128xbf16>
    %54 = vector.shape_cast %53 : vector<1x8x128xbf16> to vector<8x128xbf16>
    %55 = arith.extf %54 : vector<8x128xbf16> to vector<8x128xf32>
    %56 = arith.addf %51, %55 : vector<8x128xf32>
    %57 = arith.addf %56, %6 : vector<8x128xf32>
    %58 = vector.extract_strided_slice %57 {offsets = [0, 0], sizes = [8, 32], strides = [1, 1]} : vector<8x128xf32> to vector<8x32xf32>
    %59 = arith.negf %58 : vector<8x32xf32>
    %60 = math.exp %59 : vector<8x32xf32>
    %cst_22 = arith.constant 1.000000e+00 : f32
    %61 = vector.broadcast %cst_22 : f32 to vector<8x32xf32>
    %62 = arith.addf %61, %60 : vector<8x32xf32>
    %63 = arith.divf %61, %62 : vector<8x32xf32>
    %64 = vector.extract_strided_slice %57 {offsets = [0, 32], sizes = [8, 32], strides = [1, 1]} : vector<8x128xf32> to vector<8x32xf32>
    %65 = arith.negf %64 : vector<8x32xf32>
    %66 = math.exp %65 : vector<8x32xf32>
    %cst_23 = arith.constant 1.000000e+00 : f32
    %67 = vector.broadcast %cst_23 : f32 to vector<8x32xf32>
    %68 = arith.addf %67, %66 : vector<8x32xf32>
    %69 = arith.divf %67, %68 : vector<8x32xf32>
    %70 = vector.extract_strided_slice %57 {offsets = [0, 64], sizes = [8, 32], strides = [1, 1]} : vector<8x128xf32> to vector<8x32xf32>
    %71 = math.tanh %70 : vector<8x32xf32>
    %72 = vector.extract_strided_slice %57 {offsets = [0, 96], sizes = [8, 32], strides = [1, 1]} : vector<8x128xf32> to vector<8x32xf32>
    %73 = arith.negf %72 : vector<8x32xf32>
    %74 = math.exp %73 : vector<8x32xf32>
    %cst_24 = arith.constant 1.000000e+00 : f32
    %75 = vector.broadcast %cst_24 : f32 to vector<8x32xf32>
    %76 = arith.addf %75, %74 : vector<8x32xf32>
    %77 = arith.divf %75, %76 : vector<8x32xf32>
    %78 = arith.mulf %69, %40 : vector<8x32xf32>
    %79 = arith.mulf %63, %71 : vector<8x32xf32>
    %80 = arith.addf %78, %79 : vector<8x32xf32>
    %81 = math.tanh %80 : vector<8x32xf32>
    %82 = arith.mulf %77, %81 : vector<8x32xf32>
    %83 = arith.truncf %82 : vector<8x32xf32> to vector<8x32xbf16>
    %cst_25 = arith.constant dense<0.000000e+00> : vector<8x128xf32>
    %84 = tpu.matmul %83, %7, %cst_25 {dimension_numbers = #tpu.dot_dimension_numbers<[1], [0], [0], [1], [0, 0, 1, 1], [], []>} : vector<8x32xbf16>, vector<32x128xbf16>, vector<8x128xf32> -> vector<8x128xf32>
    %85 = arith.truncf %84 : vector<8x128xf32> to vector<8x128xbf16>
    %86 = arith.index_cast %c1_i32 : i32 to index
    %c0_26 = arith.constant 0 : index
    %c0_27 = arith.constant 0 : index
    %87 = vector.load %arg6[%86, %c0_26, %c0_27] : memref<8x8x128xbf16, #tpu.memory_space<vmem>>, vector<1x8x128xbf16>
    %88 = vector.shape_cast %87 : vector<1x8x128xbf16> to vector<8x128xbf16>
    %89 = vector.shape_cast %85 : vector<8x128xbf16> to vector<1x8x128xbf16>
    tpu.vector_store %arg6[%86, %c0_26, %c0_27], %89 {strides = array<i32>} : memref<8x8x128xbf16, #tpu.memory_space<vmem>>, vector<1x8x128xbf16>,
    %c2_i32 = arith.constant 2 : i32
    %90 = arith.truncf %82 : vector<8x32xf32> to vector<8x32xbf16>
    %cst_28 = arith.constant dense<0.000000e+00> : vector<8x128xf32>
    %91 = tpu.matmul %90, %3, %cst_28 {dimension_numbers = #tpu.dot_dimension_numbers<[1], [0], [0], [1], [0, 0, 1, 1], [], []>} : vector<8x32xbf16>, vector<32x128xbf16>, vector<8x128xf32> -> vector<8x128xf32>
    %92 = arith.index_cast %c2_i32 : i32 to index
    %c0_29 = arith.constant 0 : index
    %c0_30 = arith.constant 0 : index
    %93 = vector.load %arg2[%92, %c0_29, %c0_30] : memref<8x8x128xbf16, #tpu.memory_space<vmem>>, vector<1x8x128xbf16>
    %94 = vector.shape_cast %93 : vector<1x8x128xbf16> to vector<8x128xbf16>
    %95 = arith.extf %94 : vector<8x128xbf16> to vector<8x128xf32>
    %96 = arith.addf %91, %95 : vector<8x128xf32>
    %97 = arith.addf %96, %6 : vector<8x128xf32>
    %98 = vector.extract_strided_slice %97 {offsets = [0, 0], sizes = [8, 32], strides = [1, 1]} : vector<8x128xf32> to vector<8x32xf32>
    %99 = arith.negf %98 : vector<8x32xf32>
    %100 = math.exp %99 : vector<8x32xf32>
    %cst_31 = arith.constant 1.000000e+00 : f32
    %101 = vector.broadcast %cst_31 : f32 to vector<8x32xf32>
    %102 = arith.addf %101, %100 : vector<8x32xf32>
    %103 = arith.divf %101, %102 : vector<8x32xf32>
    %104 = vector.extract_strided_slice %97 {offsets = [0, 32], sizes = [8, 32], strides = [1, 1]} : vector<8x128xf32> to vector<8x32xf32>
    %105 = arith.negf %104 : vector<8x32xf32>
    %106 = math.exp %105 : vector<8x32xf32>
    %cst_32 = arith.constant 1.000000e+00 : f32
    %107 = vector.broadcast %cst_32 : f32 to vector<8x32xf32>
    %108 = arith.addf %107, %106 : vector<8x32xf32>
    %109 = arith.divf %107, %108 : vector<8x32xf32>
    %110 = vector.extract_strided_slice %97 {offsets = [0, 64], sizes = [8, 32], strides = [1, 1]} : vector<8x128xf32> to vector<8x32xf32>
    %111 = math.tanh %110 : vector<8x32xf32>
    %112 = vector.extract_strided_slice %97 {offsets = [0, 96], sizes = [8, 32], strides = [1, 1]} : vector<8x128xf32> to vector<8x32xf32>
    %113 = arith.negf %112 : vector<8x32xf32>
    %114 = math.exp %113 : vector<8x32xf32>
    %cst_33 = arith.constant 1.000000e+00 : f32
    %115 = vector.broadcast %cst_33 : f32 to vector<8x32xf32>
    %116 = arith.addf %115, %114 : vector<8x32xf32>
    %117 = arith.divf %115, %116 : vector<8x32xf32>
    %118 = arith.mulf %109, %80 : vector<8x32xf32>
    %119 = arith.mulf %103, %111 : vector<8x32xf32>
    %120 = arith.addf %118, %119 : vector<8x32xf32>
    %121 = math.tanh %120 : vector<8x32xf32>
    %122 = arith.mulf %117, %121 : vector<8x32xf32>
    %123 = arith.truncf %122 : vector<8x32xf32> to vector<8x32xbf16>
    %cst_34 = arith.constant dense<0.000000e+00> : vector<8x128xf32>
    %124 = tpu.matmul %123, %7, %cst_34 {dimension_numbers = #tpu.dot_dimension_numbers<[1], [0], [0], [1], [0, 0, 1, 1], [], []>} : vector<8x32xbf16>, vector<32x128xbf16>, vector<8x128xf32> -> vector<8x128xf32>
    %125 = arith.truncf %124 : vector<8x128xf32> to vector<8x128xbf16>
    %126 = arith.index_cast %c2_i32 : i32 to index
    %c0_35 = arith.constant 0 : index
    %c0_36 = arith.constant 0 : index
    %127 = vector.load %arg6[%126, %c0_35, %c0_36] : memref<8x8x128xbf16, #tpu.memory_space<vmem>>, vector<1x8x128xbf16>
    %128 = vector.shape_cast %127 : vector<1x8x128xbf16> to vector<8x128xbf16>
    %129 = vector.shape_cast %125 : vector<8x128xbf16> to vector<1x8x128xbf16>
    tpu.vector_store %arg6[%126, %c0_35, %c0_36], %129 {strides = array<i32>} : memref<8x8x128xbf16, #tpu.memory_space<vmem>>, vector<1x8x128xbf16>,
    %c3_i32 = arith.constant 3 : i32
    %130 = arith.truncf %122 : vector<8x32xf32> to vector<8x32xbf16>
    %cst_37 = arith.constant dense<0.000000e+00> : vector<8x128xf32>
    %131 = tpu.matmul %130, %3, %cst_37 {dimension_numbers = #tpu.dot_dimension_numbers<[1], [0], [0], [1], [0, 0, 1, 1], [], []>} : vector<8x32xbf16>, vector<32x128xbf16>, vector<8x128xf32> -> vector<8x128xf32>
    %132 = arith.index_cast %c3_i32 : i32 to index
    %c0_38 = arith.constant 0 : index
    %c0_39 = arith.constant 0 : index
    %133 = vector.load %arg2[%132, %c0_38, %c0_39] : memref<8x8x128xbf16, #tpu.memory_space<vmem>>, vector<1x8x128xbf16>
    %134 = vector.shape_cast %133 : vector<1x8x128xbf16> to vector<8x128xbf16>
    %135 = arith.extf %134 : vector<8x128xbf16> to vector<8x128xf32>
    %136 = arith.addf %131, %135 : vector<8x128xf32>
    %137 = arith.addf %136, %6 : vector<8x128xf32>
    %138 = vector.extract_strided_slice %137 {offsets = [0, 0], sizes = [8, 32], strides = [1, 1]} : vector<8x128xf32> to vector<8x32xf32>
    %139 = arith.negf %138 : vector<8x32xf32>
    %140 = math.exp %139 : vector<8x32xf32>
    %cst_40 = arith.constant 1.000000e+00 : f32
    %141 = vector.broadcast %cst_40 : f32 to vector<8x32xf32>
    %142 = arith.addf %141, %140 : vector<8x32xf32>
    %143 = arith.divf %141, %142 : vector<8x32xf32>
    %144 = vector.extract_strided_slice %137 {offsets = [0, 32], sizes = [8, 32], strides = [1, 1]} : vector<8x128xf32> to vector<8x32xf32>
    %145 = arith.negf %144 : vector<8x32xf32>
    %146 = math.exp %145 : vector<8x32xf32>
    %cst_41 = arith.constant 1.000000e+00 : f32
    %147 = vector.broadcast %cst_41 : f32 to vector<8x32xf32>
    %148 = arith.addf %147, %146 : vector<8x32xf32>
    %149 = arith.divf %147, %148 : vector<8x32xf32>
    %150 = vector.extract_strided_slice %137 {offsets = [0, 64], sizes = [8, 32], strides = [1, 1]} : vector<8x128xf32> to vector<8x32xf32>
    %151 = math.tanh %150 : vector<8x32xf32>
    %152 = vector.extract_strided_slice %137 {offsets = [0, 96], sizes = [8, 32], strides = [1, 1]} : vector<8x128xf32> to vector<8x32xf32>
    %153 = arith.negf %152 : vector<8x32xf32>
    %154 = math.exp %153 : vector<8x32xf32>
    %cst_42 = arith.constant 1.000000e+00 : f32
    %155 = vector.broadcast %cst_42 : f32 to vector<8x32xf32>
    %156 = arith.addf %155, %154 : vector<8x32xf32>
    %157 = arith.divf %155, %156 : vector<8x32xf32>
    %158 = arith.mulf %149, %120 : vector<8x32xf32>
    %159 = arith.mulf %143, %151 : vector<8x32xf32>
    %160 = arith.addf %158, %159 : vector<8x32xf32>
    %161 = math.tanh %160 : vector<8x32xf32>
    %162 = arith.mulf %157, %161 : vector<8x32xf32>
    %163 = arith.truncf %162 : vector<8x32xf32> to vector<8x32xbf16>
    %cst_43 = arith.constant dense<0.000000e+00> : vector<8x128xf32>
    %164 = tpu.matmul %163, %7, %cst_43 {dimension_numbers = #tpu.dot_dimension_numbers<[1], [0], [0], [1], [0, 0, 1, 1], [], []>} : vector<8x32xbf16>, vector<32x128xbf16>, vector<8x128xf32> -> vector<8x128xf32>
    %165 = arith.truncf %164 : vector<8x128xf32> to vector<8x128xbf16>
    %166 = arith.index_cast %c3_i32 : i32 to index
    %c0_44 = arith.constant 0 : index
    %c0_45 = arith.constant 0 : index
    %167 = vector.load %arg6[%166, %c0_44, %c0_45] : memref<8x8x128xbf16, #tpu.memory_space<vmem>>, vector<1x8x128xbf16>
    %168 = vector.shape_cast %167 : vector<1x8x128xbf16> to vector<8x128xbf16>
    %169 = vector.shape_cast %165 : vector<8x128xbf16> to vector<1x8x128xbf16>
    tpu.vector_store %arg6[%166, %c0_44, %c0_45], %169 {strides = array<i32>} : memref<8x8x128xbf16, #tpu.memory_space<vmem>>, vector<1x8x128xbf16>,
    %c4_i32 = arith.constant 4 : i32
    %170 = arith.truncf %162 : vector<8x32xf32> to vector<8x32xbf16>
    %cst_46 = arith.constant dense<0.000000e+00> : vector<8x128xf32>
    %171 = tpu.matmul %170, %3, %cst_46 {dimension_numbers = #tpu.dot_dimension_numbers<[1], [0], [0], [1], [0, 0, 1, 1], [], []>} : vector<8x32xbf16>, vector<32x128xbf16>, vector<8x128xf32> -> vector<8x128xf32>
    %172 = arith.index_cast %c4_i32 : i32 to index
    %c0_47 = arith.constant 0 : index
    %c0_48 = arith.constant 0 : index
    %173 = vector.load %arg2[%172, %c0_47, %c0_48] : memref<8x8x128xbf16, #tpu.memory_space<vmem>>, vector<1x8x128xbf16>
    %174 = vector.shape_cast %173 : vector<1x8x128xbf16> to vector<8x128xbf16>
    %175 = arith.extf %174 : vector<8x128xbf16> to vector<8x128xf32>
    %176 = arith.addf %171, %175 : vector<8x128xf32>
    %177 = arith.addf %176, %6 : vector<8x128xf32>
    %178 = vector.extract_strided_slice %177 {offsets = [0, 0], sizes = [8, 32], strides = [1, 1]} : vector<8x128xf32> to vector<8x32xf32>
    %179 = arith.negf %178 : vector<8x32xf32>
    %180 = math.exp %179 : vector<8x32xf32>
    %cst_49 = arith.constant 1.000000e+00 : f32
    %181 = vector.broadcast %cst_49 : f32 to vector<8x32xf32>
    %182 = arith.addf %181, %180 : vector<8x32xf32>
    %183 = arith.divf %181, %182 : vector<8x32xf32>
    %184 = vector.extract_strided_slice %177 {offsets = [0, 32], sizes = [8, 32], strides = [1, 1]} : vector<8x128xf32> to vector<8x32xf32>
    %185 = arith.negf %184 : vector<8x32xf32>
    %186 = math.exp %185 : vector<8x32xf32>
    %cst_50 = arith.constant 1.000000e+00 : f32
    %187 = vector.broadcast %cst_50 : f32 to vector<8x32xf32>
    %188 = arith.addf %187, %186 : vector<8x32xf32>
    %189 = arith.divf %187, %188 : vector<8x32xf32>
    %190 = vector.extract_strided_slice %177 {offsets = [0, 64], sizes = [8, 32], strides = [1, 1]} : vector<8x128xf32> to vector<8x32xf32>
    %191 = math.tanh %190 : vector<8x32xf32>
    %192 = vector.extract_strided_slice %177 {offsets = [0, 96], sizes = [8, 32], strides = [1, 1]} : vector<8x128xf32> to vector<8x32xf32>
    %193 = arith.negf %192 : vector<8x32xf32>
    %194 = math.exp %193 : vector<8x32xf32>
    %cst_51 = arith.constant 1.000000e+00 : f32
    %195 = vector.broadcast %cst_51 : f32 to vector<8x32xf32>
    %196 = arith.addf %195, %194 : vector<8x32xf32>
    %197 = arith.divf %195, %196 : vector<8x32xf32>
    %198 = arith.mulf %189, %160 : vector<8x32xf32>
    %199 = arith.mulf %183, %191 : vector<8x32xf32>
    %200 = arith.addf %198, %199 : vector<8x32xf32>
    %201 = math.tanh %200 : vector<8x32xf32>
    %202 = arith.mulf %197, %201 : vector<8x32xf32>
    %203 = arith.truncf %202 : vector<8x32xf32> to vector<8x32xbf16>
    %cst_52 = arith.constant dense<0.000000e+00> : vector<8x128xf32>
    %204 = tpu.matmul %203, %7, %cst_52 {dimension_numbers = #tpu.dot_dimension_numbers<[1], [0], [0], [1], [0, 0, 1, 1], [], []>} : vector<8x32xbf16>, vector<32x128xbf16>, vector<8x128xf32> -> vector<8x128xf32>
    %205 = arith.truncf %204 : vector<8x128xf32> to vector<8x128xbf16>
    %206 = arith.index_cast %c4_i32 : i32 to index
    %c0_53 = arith.constant 0 : index
    %c0_54 = arith.constant 0 : index
    %207 = vector.load %arg6[%206, %c0_53, %c0_54] : memref<8x8x128xbf16, #tpu.memory_space<vmem>>, vector<1x8x128xbf16>
    %208 = vector.shape_cast %207 : vector<1x8x128xbf16> to vector<8x128xbf16>
    %209 = vector.shape_cast %205 : vector<8x128xbf16> to vector<1x8x128xbf16>
    tpu.vector_store %arg6[%206, %c0_53, %c0_54], %209 {strides = array<i32>} : memref<8x8x128xbf16, #tpu.memory_space<vmem>>, vector<1x8x128xbf16>,
    %c5_i32 = arith.constant 5 : i32
    %210 = arith.truncf %202 : vector<8x32xf32> to vector<8x32xbf16>
    %cst_55 = arith.constant dense<0.000000e+00> : vector<8x128xf32>
    %211 = tpu.matmul %210, %3, %cst_55 {dimension_numbers = #tpu.dot_dimension_numbers<[1], [0], [0], [1], [0, 0, 1, 1], [], []>} : vector<8x32xbf16>, vector<32x128xbf16>, vector<8x128xf32> -> vector<8x128xf32>
    %212 = arith.index_cast %c5_i32 : i32 to index
    %c0_56 = arith.constant 0 : index
    %c0_57 = arith.constant 0 : index
    %213 = vector.load %arg2[%212, %c0_56, %c0_57] : memref<8x8x128xbf16, #tpu.memory_space<vmem>>, vector<1x8x128xbf16>
    %214 = vector.shape_cast %213 : vector<1x8x128xbf16> to vector<8x128xbf16>
    %215 = arith.extf %214 : vector<8x128xbf16> to vector<8x128xf32>
    %216 = arith.addf %211, %215 : vector<8x128xf32>
    %217 = arith.addf %216, %6 : vector<8x128xf32>
    %218 = vector.extract_strided_slice %217 {offsets = [0, 0], sizes = [8, 32], strides = [1, 1]} : vector<8x128xf32> to vector<8x32xf32>
    %219 = arith.negf %218 : vector<8x32xf32>
    %220 = math.exp %219 : vector<8x32xf32>
    %cst_58 = arith.constant 1.000000e+00 : f32
    %221 = vector.broadcast %cst_58 : f32 to vector<8x32xf32>
    %222 = arith.addf %221, %220 : vector<8x32xf32>
    %223 = arith.divf %221, %222 : vector<8x32xf32>
    %224 = vector.extract_strided_slice %217 {offsets = [0, 32], sizes = [8, 32], strides = [1, 1]} : vector<8x128xf32> to vector<8x32xf32>
    %225 = arith.negf %224 : vector<8x32xf32>
    %226 = math.exp %225 : vector<8x32xf32>
    %cst_59 = arith.constant 1.000000e+00 : f32
    %227 = vector.broadcast %cst_59 : f32 to vector<8x32xf32>
    %228 = arith.addf %227, %226 : vector<8x32xf32>
    %229 = arith.divf %227, %228 : vector<8x32xf32>
    %230 = vector.extract_strided_slice %217 {offsets = [0, 64], sizes = [8, 32], strides = [1, 1]} : vector<8x128xf32> to vector<8x32xf32>
    %231 = math.tanh %230 : vector<8x32xf32>
    %232 = vector.extract_strided_slice %217 {offsets = [0, 96], sizes = [8, 32], strides = [1, 1]} : vector<8x128xf32> to vector<8x32xf32>
    %233 = arith.negf %232 : vector<8x32xf32>
    %234 = math.exp %233 : vector<8x32xf32>
    %cst_60 = arith.constant 1.000000e+00 : f32
    %235 = vector.broadcast %cst_60 : f32 to vector<8x32xf32>
    %236 = arith.addf %235, %234 : vector<8x32xf32>
    %237 = arith.divf %235, %236 : vector<8x32xf32>
    %238 = arith.mulf %229, %200 : vector<8x32xf32>
    %239 = arith.mulf %223, %231 : vector<8x32xf32>
    %240 = arith.addf %238, %239 : vector<8x32xf32>
    %241 = math.tanh %240 : vector<8x32xf32>
    %242 = arith.mulf %237, %241 : vector<8x32xf32>
    %243 = arith.truncf %242 : vector<8x32xf32> to vector<8x32xbf16>
    %cst_61 = arith.constant dense<0.000000e+00> : vector<8x128xf32>
    %244 = tpu.matmul %243, %7, %cst_61 {dimension_numbers = #tpu.dot_dimension_numbers<[1], [0], [0], [1], [0, 0, 1, 1], [], []>} : vector<8x32xbf16>, vector<32x128xbf16>, vector<8x128xf32> -> vector<8x128xf32>
    %245 = arith.truncf %244 : vector<8x128xf32> to vector<8x128xbf16>
    %246 = arith.index_cast %c5_i32 : i32 to index
    %c0_62 = arith.constant 0 : index
    %c0_63 = arith.constant 0 : index
    %247 = vector.load %arg6[%246, %c0_62, %c0_63] : memref<8x8x128xbf16, #tpu.memory_space<vmem>>, vector<1x8x128xbf16>
    %248 = vector.shape_cast %247 : vector<1x8x128xbf16> to vector<8x128xbf16>
    %249 = vector.shape_cast %245 : vector<8x128xbf16> to vector<1x8x128xbf16>
    tpu.vector_store %arg6[%246, %c0_62, %c0_63], %249 {strides = array<i32>} : memref<8x8x128xbf16, #tpu.memory_space<vmem>>, vector<1x8x128xbf16>,
    %c6_i32 = arith.constant 6 : i32
    %250 = arith.truncf %242 : vector<8x32xf32> to vector<8x32xbf16>
    %cst_64 = arith.constant dense<0.000000e+00> : vector<8x128xf32>
    %251 = tpu.matmul %250, %3, %cst_64 {dimension_numbers = #tpu.dot_dimension_numbers<[1], [0], [0], [1], [0, 0, 1, 1], [], []>} : vector<8x32xbf16>, vector<32x128xbf16>, vector<8x128xf32> -> vector<8x128xf32>
    %252 = arith.index_cast %c6_i32 : i32 to index
    %c0_65 = arith.constant 0 : index
    %c0_66 = arith.constant 0 : index
    %253 = vector.load %arg2[%252, %c0_65, %c0_66] : memref<8x8x128xbf16, #tpu.memory_space<vmem>>, vector<1x8x128xbf16>
    %254 = vector.shape_cast %253 : vector<1x8x128xbf16> to vector<8x128xbf16>
    %255 = arith.extf %254 : vector<8x128xbf16> to vector<8x128xf32>
    %256 = arith.addf %251, %255 : vector<8x128xf32>
    %257 = arith.addf %256, %6 : vector<8x128xf32>
    %258 = vector.extract_strided_slice %257 {offsets = [0, 0], sizes = [8, 32], strides = [1, 1]} : vector<8x128xf32> to vector<8x32xf32>
    %259 = arith.negf %258 : vector<8x32xf32>
    %260 = math.exp %259 : vector<8x32xf32>
    %cst_67 = arith.constant 1.000000e+00 : f32
    %261 = vector.broadcast %cst_67 : f32 to vector<8x32xf32>
    %262 = arith.addf %261, %260 : vector<8x32xf32>
    %263 = arith.divf %261, %262 : vector<8x32xf32>
    %264 = vector.extract_strided_slice %257 {offsets = [0, 32], sizes = [8, 32], strides = [1, 1]} : vector<8x128xf32> to vector<8x32xf32>
    %265 = arith.negf %264 : vector<8x32xf32>
    %266 = math.exp %265 : vector<8x32xf32>
    %cst_68 = arith.constant 1.000000e+00 : f32
    %267 = vector.broadcast %cst_68 : f32 to vector<8x32xf32>
    %268 = arith.addf %267, %266 : vector<8x32xf32>
    %269 = arith.divf %267, %268 : vector<8x32xf32>
    %270 = vector.extract_strided_slice %257 {offsets = [0, 64], sizes = [8, 32], strides = [1, 1]} : vector<8x128xf32> to vector<8x32xf32>
    %271 = math.tanh %270 : vector<8x32xf32>
    %272 = vector.extract_strided_slice %257 {offsets = [0, 96], sizes = [8, 32], strides = [1, 1]} : vector<8x128xf32> to vector<8x32xf32>
    %273 = arith.negf %272 : vector<8x32xf32>
    %274 = math.exp %273 : vector<8x32xf32>
    %cst_69 = arith.constant 1.000000e+00 : f32
    %275 = vector.broadcast %cst_69 : f32 to vector<8x32xf32>
    %276 = arith.addf %275, %274 : vector<8x32xf32>
    %277 = arith.divf %275, %276 : vector<8x32xf32>
    %278 = arith.mulf %269, %240 : vector<8x32xf32>
    %279 = arith.mulf %263, %271 : vector<8x32xf32>
    %280 = arith.addf %278, %279 : vector<8x32xf32>
    %281 = math.tanh %280 : vector<8x32xf32>
    %282 = arith.mulf %277, %281 : vector<8x32xf32>
    %283 = arith.truncf %282 : vector<8x32xf32> to vector<8x32xbf16>
    %cst_70 = arith.constant dense<0.000000e+00> : vector<8x128xf32>
    %284 = tpu.matmul %283, %7, %cst_70 {dimension_numbers = #tpu.dot_dimension_numbers<[1], [0], [0], [1], [0, 0, 1, 1], [], []>} : vector<8x32xbf16>, vector<32x128xbf16>, vector<8x128xf32> -> vector<8x128xf32>
    %285 = arith.truncf %284 : vector<8x128xf32> to vector<8x128xbf16>
    %286 = arith.index_cast %c6_i32 : i32 to index
    %c0_71 = arith.constant 0 : index
    %c0_72 = arith.constant 0 : index
    %287 = vector.load %arg6[%286, %c0_71, %c0_72] : memref<8x8x128xbf16, #tpu.memory_space<vmem>>, vector<1x8x128xbf16>
    %288 = vector.shape_cast %287 : vector<1x8x128xbf16> to vector<8x128xbf16>
    %289 = vector.shape_cast %285 : vector<8x128xbf16> to vector<1x8x128xbf16>
    tpu.vector_store %arg6[%286, %c0_71, %c0_72], %289 {strides = array<i32>} : memref<8x8x128xbf16, #tpu.memory_space<vmem>>, vector<1x8x128xbf16>,
    %c7_i32 = arith.constant 7 : i32
    %290 = arith.truncf %282 : vector<8x32xf32> to vector<8x32xbf16>
    %cst_73 = arith.constant dense<0.000000e+00> : vector<8x128xf32>
    %291 = tpu.matmul %290, %3, %cst_73 {dimension_numbers = #tpu.dot_dimension_numbers<[1], [0], [0], [1], [0, 0, 1, 1], [], []>} : vector<8x32xbf16>, vector<32x128xbf16>, vector<8x128xf32> -> vector<8x128xf32>
    %292 = arith.index_cast %c7_i32 : i32 to index
    %c0_74 = arith.constant 0 : index
    %c0_75 = arith.constant 0 : index
    %293 = vector.load %arg2[%292, %c0_74, %c0_75] : memref<8x8x128xbf16, #tpu.memory_space<vmem>>, vector<1x8x128xbf16>
    %294 = vector.shape_cast %293 : vector<1x8x128xbf16> to vector<8x128xbf16>
    %295 = arith.extf %294 : vector<8x128xbf16> to vector<8x128xf32>
    %296 = arith.addf %291, %295 : vector<8x128xf32>
    %297 = arith.addf %296, %6 : vector<8x128xf32>
    %298 = vector.extract_strided_slice %297 {offsets = [0, 0], sizes = [8, 32], strides = [1, 1]} : vector<8x128xf32> to vector<8x32xf32>
    %299 = arith.negf %298 : vector<8x32xf32>
    %300 = math.exp %299 : vector<8x32xf32>
    %cst_76 = arith.constant 1.000000e+00 : f32
    %301 = vector.broadcast %cst_76 : f32 to vector<8x32xf32>
    %302 = arith.addf %301, %300 : vector<8x32xf32>
    %303 = arith.divf %301, %302 : vector<8x32xf32>
    %304 = vector.extract_strided_slice %297 {offsets = [0, 32], sizes = [8, 32], strides = [1, 1]} : vector<8x128xf32> to vector<8x32xf32>
    %305 = arith.negf %304 : vector<8x32xf32>
    %306 = math.exp %305 : vector<8x32xf32>
    %cst_77 = arith.constant 1.000000e+00 : f32
    %307 = vector.broadcast %cst_77 : f32 to vector<8x32xf32>
    %308 = arith.addf %307, %306 : vector<8x32xf32>
    %309 = arith.divf %307, %308 : vector<8x32xf32>
    %310 = vector.extract_strided_slice %297 {offsets = [0, 64], sizes = [8, 32], strides = [1, 1]} : vector<8x128xf32> to vector<8x32xf32>
    %311 = math.tanh %310 : vector<8x32xf32>
    %312 = vector.extract_strided_slice %297 {offsets = [0, 96], sizes = [8, 32], strides = [1, 1]} : vector<8x128xf32> to vector<8x32xf32>
    %313 = arith.negf %312 : vector<8x32xf32>
    %314 = math.exp %313 : vector<8x32xf32>
    %cst_78 = arith.constant 1.000000e+00 : f32
    %315 = vector.broadcast %cst_78 : f32 to vector<8x32xf32>
    %316 = arith.addf %315, %314 : vector<8x32xf32>
    %317 = arith.divf %315, %316 : vector<8x32xf32>
    %318 = arith.mulf %309, %280 : vector<8x32xf32>
    %319 = arith.mulf %303, %311 : vector<8x32xf32>
    %320 = arith.addf %318, %319 : vector<8x32xf32>
    %321 = math.tanh %320 : vector<8x32xf32>
    %322 = arith.mulf %317, %321 : vector<8x32xf32>
    %323 = arith.truncf %322 : vector<8x32xf32> to vector<8x32xbf16>
    %cst_79 = arith.constant dense<0.000000e+00> : vector<8x128xf32>
    %324 = tpu.matmul %323, %7, %cst_79 {dimension_numbers = #tpu.dot_dimension_numbers<[1], [0], [0], [1], [0, 0, 1, 1], [], []>} : vector<8x32xbf16>, vector<32x128xbf16>, vector<8x128xf32> -> vector<8x128xf32>
    %325 = arith.truncf %324 : vector<8x128xf32> to vector<8x128xbf16>
    %326 = arith.index_cast %c7_i32 : i32 to index
    %c0_80 = arith.constant 0 : index
    %c0_81 = arith.constant 0 : index
    %327 = vector.load %arg6[%326, %c0_80, %c0_81] : memref<8x8x128xbf16, #tpu.memory_space<vmem>>, vector<1x8x128xbf16>
    %328 = vector.shape_cast %327 : vector<1x8x128xbf16> to vector<8x128xbf16>
    %329 = vector.shape_cast %325 : vector<8x128xbf16> to vector<1x8x128xbf16>
    tpu.vector_store %arg6[%326, %c0_80, %c0_81], %329 {strides = array<i32>} : memref<8x8x128xbf16, #tpu.memory_space<vmem>>, vector<1x8x128xbf16>,
    %c8_i32 = arith.constant 8 : i32
    %c0_82 = arith.constant 0 : index
    %c0_83 = arith.constant 0 : index
    %330 = vector.load %arg7[%c0_82, %c0_83] : memref<8x32xf32, #tpu.memory_space<vmem>>, vector<8x32xf32>
    tpu.vector_store %arg7[%c0_82, %c0_83], %322 {strides = array<i32>} : memref<8x32xf32, #tpu.memory_space<vmem>>, vector<8x32xf32>,
    %c0_84 = arith.constant 0 : index
    %c0_85 = arith.constant 0 : index
    %331 = vector.load %arg8[%c0_84, %c0_85] : memref<8x32xf32, #tpu.memory_space<vmem>>, vector<8x32xf32>
    tpu.vector_store %arg8[%c0_84, %c0_85], %320 {strides = array<i32>} : memref<8x32xf32, #tpu.memory_space<vmem>>, vector<8x32xf32>,
    return
  }
  func.func @transform_0(%arg0: i32, %arg1: i32) -> (i32, i32, i32) {
    %c0_i32 = arith.constant 0 : i32
    %c0_i32_0 = arith.constant 0 : i32
    return %arg1, %arg0, %c0_i32 : i32, i32, i32
  }
  func.func @transform_1(%arg0: i32, %arg1: i32) -> (i32, i32) {
    %c0_i32 = arith.constant 0 : i32
    %c0_i32_0 = arith.constant 0 : i32
    %c0_i32_1 = arith.constant 0 : i32
    return %c0_i32, %c0_i32_0 : i32, i32
  }
  func.func @transform_2(%arg0: i32, %arg1: i32) -> (i32, i32) {
    %c0_i32 = arith.constant 0 : i32
    %c0_i32_0 = arith.constant 0 : i32
    %c0_i32_1 = arith.constant 0 : i32
    return %c0_i32, %c0_i32_0 : i32, i32
  }
  func.func @transform_3(%arg0: i32, %arg1: i32) -> (i32, i32) {
    %c0_i32 = arith.constant 0 : i32
    %c0_i32_0 = arith.constant 0 : i32
    %c0_i32_1 = arith.constant 0 : i32
    return %c0_i32, %c0_i32_0 : i32, i32
  }
  func.func @transform_4(%arg0: i32, %arg1: i32) -> (i32, i32, i32) {
    %c0_i32 = arith.constant 0 : i32
    %c0_i32_0 = arith.constant 0 : i32
    return %arg1, %arg0, %c0_i32 : i32, i32, i32
  }
  func.func @transform_5(%arg0: i32, %arg1: i32) -> (i32, i32) {
    %c0_i32 = arith.constant 0 : i32
    %c0_i32_0 = arith.constant 0 : i32
    return %arg0, %c0_i32 : i32, i32
  }
  func.func @transform_6(%arg0: i32, %arg1: i32) -> (i32, i32) {
    %c0_i32 = arith.constant 0 : i32
    %c0_i32_0 = arith.constant 0 : i32
    return %arg0, %c0_i32 : i32, i32
  }
}

</mosaic_0001>

<bundles_post_ra>
// kernel: encoder_forward.3
= control target key start
LH: loop header
LB: loop body
LE: loop exit
PB: predicated region body
PF: predicated region fallthrough
CT: control target
= control target key end

     0   :  { %vm21_vm0 = vcmask 261120   ;;  %v853_v0 = vmov 0.0   ;;  %vm854_vm1 = vmmov 0   ;;  %s855_s28 = smov 64   ;;  %s856_s5 = smov 32   ;;  %s1034_s2 = inlined_call_operand.vmem [shape: bf16[32,128], index: 2, kind: input, shape index: {}]   ;;  %s1035_s3 = inlined_call_operand.vmem [shape: f32[8,32], index: 3, kind: output, shape index: {0}]   ;;  %s1036_s4 = inlined_call_operand.vmem [shape: f32[8,32], index: 4, kind: output, shape index: {1}]   ;;  %s1037_s0 = inlined_call_operand.vmem [shape: bf16[8,8,128], index: 0, kind: input, shape index: {}]   ;;  %s1038_s1 = inlined_call_operand.vmem [shape: f32[1,128], index: 1, kind: input, shape index: {}]  }
   0x1   :  { %718 = vmatprep.subr.bf16.mxu0 %v853_v0  ;;  %v887_v1 = vld [vmem:[%s1034_s2 + $0x8] sm:$0xff]   ;;  %722 = vmatprep.mubr.msk.bf16.mxu0 %vm854_vm1, %v853_v0  ;;  %22 = vst.msk [vmem:[%s1035_s3] sm:$0xff] %vm21_vm0, %v853_v0  ;;  %v903_v2 = vld [vmem:[%s1034_s2] sm:$0xff]   ;;  %23 = vst.msk [vmem:[%s1036_s4] sm:$0xff] %vm21_vm0, %v853_v0 }
   0x2   :  { %726 = vmatprep.subr.bf16.mxu1 %v853_v0  ;;  %730 = vmatprep.mubr.msk.bf16.mxu1 %vm854_vm1, %v853_v0  ;;  %v38_v5 = vld [vmem:[%s1037_s0] sm:$0xf]  ;;  %v673_v31 = vld [vmem:[%s1037_s0 + $0x4] sm:$0xff]  }
   0x3   :  { %719 = vmatpush3.bf16.msra.mxu0 %v887_v1  ;;  %727 = vmatpush3.bf16.msra.mxu1 %v887_v1  ;;  %v39_v6 = vunpack.c.l.bf16 %v38_v5  ;;  %v933_v7 = vld [vmem:[%s1038_s1] ss:$0 sm:$0xff]  ;;  %v128_v32 = vunpack.c.l.bf16 %v673_v31  ;;  %v203_v54 = vunpack.c.h.bf16 %v673_v31 }
   0x4   :  { %720 = vmatprep.subr.bf16.mxu0 %v853_v0  ;;  %728 = vmatprep.subr.bf16.mxu1 %v853_v0 }
   0x7   :  { %721 = vmatpush3.bf16.msra.mxu0 %v903_v2  ;;  %729 = vmatpush3.bf16.msra.mxu1 %v903_v2 }
   0x8   :  { %v35_v3 = vld [vmem:[%s1035_s3] sm:$0xff]  ;;  %734 = vmatprep.subr.bf16.mxu0 %v853_v0  ;;  %742 = vmatprep.subr.bf16.mxu1 %v853_v0 }
   0x9   :  { %v37_v4 = vpack.c.bf16 %v35_v3, %v35_v3  ;;  %v36_v15 = vld [vmem:[%s1036_s4] sm:$0xff] }
   0xb   :  { %723 = vmatmul.mubr.msk.bf16.vlgmr.msra.gmra.mxu0 %vm21_vm0, %v37_v4 }
   0xc   :  { %735 = vmatpush3.bf16.msra.mxu0 %v887_v1  ;;  %738 = vmatprep.mubr.msk.bf16.mxu0 %vm854_vm1, %v853_v0 }
   0xd   :  { %736 = vmatprep.subr.bf16.mxu0 %v853_v0 }
  0x10   :  { %737 = vmatpush3.bf16.msra.mxu0 %v903_v2 }
  0x11   :  { %750 = vmatprep.subr.bf16.mxu0 %v853_v0 }
  0xcb   :  { %v90_v8 = vpop.f32.mrf.mxu0 }
  0xcc   :  { %v91_v9 = vadd.f32 %v90_v8, %v39_v6 }
  0xcd   :  { %v724_v10 = vpop.f32.mrf.mxu0 }
  0xce   :  { %v96_v11 = vadd.f32 %v933_v7, %v91_v9 }
  0xcf   :  { %v93_v12 = vpop.f32.mrf.mxu0 }
  0xd0   :  { %789 = vtanh.f32 %v96_v11  ;;  %v672_v16 = vmul.f32 -1.442695, %v96_v11 }
  0xd1   :  { %v725_v13 = vpop.f32.mrf.mxu0 }
  0xd2   :  { %791 = vpow2.f32 %v672_v16  ;;  %v679_v16 = vld [vmem:[%s1037_s0 + $0xc] sm:$0xff]  }
  0xdd   :  { %v790_v14 = vpop.eup %789 }
  0xde   :  { %110 = vrot.lane.b32.xlu0 %v790_v14, %s855_s28 }
  0xdf   :  { %v792_v17 = vpop.eup %791 }
  0xe0   :  { %v100_v18 = vadd.f32 1.0, %v792_v17  ;;  %v278_v17 = vunpack.c.l.bf16 %v679_v16 }
  0xe2   :  { %105 = vrot.lane.b32.xlu0 %v36_v15, %s856_s5  ;;  %793 = vrcp.f32 %v100_v18 }
  0xef   :  { %v794_v19 = vpop.eup %793 }
 0x150   :  { %v111_v20 = vpop.permute.xlu0 %110 }
 0x151   :  { %v113_v21 = vmul.f32 %v794_v19, %v111_v20 }
 0x153   :  { %115 = vrot.lane.b32.xlu1 %v113_v21, %s856_s5 }
 0x154   :  { %v106_v22 = vpop.permute.xlu0 %105 }
 0x155   :  { %v108_v23 = vmul.f32 %v794_v19, %v106_v22 }
 0x1c5   :  { %v116_v24 = vpop.permute.xlu1 %115 }
 0x1c6   :  { %v118_v25 = vadd.f32 %v116_v24, %v108_v23 }
 0x1c8   :  { %795 = vtanh.f32 %v118_v25 }
 0x1d5   :  { %v796_v26 = vpop.eup %795 }
 0x1d6   :  { %121 = vrot.lane.b32.xlu1 %v796_v26, %s855_s28 }
 0x248   :  { %v122_v27 = vpop.permute.xlu1 %121 }
 0x249   :  { %v124_v28 = vmul.f32 %v794_v19, %v122_v27 }
 0x24b   :  { %v125_v29 = vpack.c.bf16 %v124_v28, %v124_v28 }
 0x24d   :  { %130 = vrot.lane.b32.xlu0 %v125_v29, %s856_s5 }
 0x2bf   :  { %v131_v30 = vpop.permute.xlu0 %130 }
 0x2c0   :  { %731 = vmatmul.mubr.msk.bf16.vlgmr.msra.gmra.mxu1 %vm21_vm0, %v131_v30 }
 0x2c1   :  { %743 = vmatpush3.bf16.msra.mxu1 %v887_v1  ;;  %746 = vmatprep.mubr.msk.bf16.mxu1 %vm854_vm1, %v853_v0 }
 0x2c2   :  { %744 = vmatprep.subr.bf16.mxu1 %v853_v0 }
 0x2c5   :  { %745 = vmatpush3.bf16.msra.mxu1 %v903_v2 }
 0x2c6   :  { %758 = vmatprep.subr.bf16.mxu1 %v853_v0 }
 0x380   :  { %v169_v33 = vpop.f32.mrf.mxu1 }
 0x381   :  { %v170_v34 = vadd.f32 %v169_v33, %v128_v32 }
 0x382   :  { %v732_v35 = vpop.f32.mrf.mxu1 }
 0x383   :  { %v175_v36 = vadd.f32 %v933_v7, %v170_v34 }
 0x384   :  { %v172_v37 = vpop.f32.mrf.mxu1 }
 0x385   :  { %797 = vtanh.f32 %v175_v36  ;;  %v675_v40 = vmul.f32 -1.442695, %v175_v36 }
 0x386   :  { %v733_v38 = vpop.f32.mrf.mxu1 }
 0x387   :  { %799 = vpow2.f32 %v675_v40 }
 0x392   :  { %v798_v39 = vpop.eup %797 }
 0x393   :  { %185 = vrot.lane.b32.xlu1 %v798_v39, %s855_s28  ;;  %v353_v39 = vunpack.c.h.bf16 %v679_v16 }
 0x394   :  { %v800_v41 = vpop.eup %799 }
 0x395   :  { %v179_v42 = vadd.f32 1.0, %v800_v41 }
 0x397   :  { %801 = vrcp.f32 %v179_v42 }
 0x3a4   :  { %v802_v43 = vpop.eup %801 }
 0x3a5   :  { %v183_v46 = vmul.f32 %v802_v43, %v118_v25 }
 0x405   :  { %v186_v44 = vpop.permute.xlu1 %185 }
 0x406   :  { %v188_v45 = vmul.f32 %v802_v43, %v186_v44 }
 0x408   :  { %190 = vrot.lane.b32.xlu0 %v188_v45, %s856_s5 }
 0x47a   :  { %v191_v47 = vpop.permute.xlu0 %190 }
 0x47b   :  { %v193_v48 = vadd.f32 %v191_v47, %v183_v46 }
 0x47d   :  { %803 = vtanh.f32 %v193_v48 }
 0x48a   :  { %v804_v49 = vpop.eup %803 }
 0x48b   :  { %196 = vrot.lane.b32.xlu1 %v804_v49, %s855_s28 }
 0x4fd   :  { %v197_v50 = vpop.permute.xlu1 %196 }
 0x4fe   :  { %v199_v51 = vmul.f32 %v802_v43, %v197_v50 }
 0x500   :  { %v200_v52 = vpack.c.bf16 %v199_v51, %v199_v51 }
 0x502   :  { %205 = vrot.lane.b32.xlu0 %v200_v52, %s856_s5 }
 0x574   :  { %v206_v53 = vpop.permute.xlu0 %205 }
 0x575   :  { %739 = vmatmul.mubr.msk.bf16.vlgmr.msra.gmra.mxu0 %vm21_vm0, %v206_v53 }
 0x576   :  { %751 = vmatpush3.bf16.msra.mxu0 %v887_v1  ;;  %754 = vmatprep.mubr.msk.bf16.mxu0 %vm854_vm1, %v853_v0 }
 0x577   :  { %752 = vmatprep.subr.bf16.mxu0 %v853_v0 }
 0x57a   :  { %753 = vmatpush3.bf16.msra.mxu0 %v903_v2 }
 0x57b   :  { %766 = vmatprep.subr.bf16.mxu0 %v853_v0 }
 0x635   :  { %v244_v55 = vpop.f32.mrf.mxu0 }
 0x636   :  { %v245_v56 = vadd.f32 %v244_v55, %v203_v54 }
 0x637   :  { %v740_v57 = vpop.f32.mrf.mxu0 }
 0x638   :  { %v250_v58 = vadd.f32 %v933_v7, %v245_v56 }
 0x639   :  { %v247_v59 = vpop.f32.mrf.mxu0 }
 0x63a   :  { %805 = vtanh.f32 %v250_v58  ;;  %v678_v62 = vmul.f32 -1.442695, %v250_v58 }
 0x63b   :  { %v741_v60 = vpop.f32.mrf.mxu0 }
 0x63c   :  { %807 = vpow2.f32 %v678_v62 }
 0x647   :  { %v806_v61 = vpop.eup %805 }
 0x648   :  { %260 = vrot.lane.b32.xlu1 %v806_v61, %s855_s28  ;;  %v685_v61 = vld [vmem:[%s1037_s0 + $0x14] sm:$0xff]  }
 0x649   :  { %v808_v63 = vpop.eup %807  ;;  %v428_v62 = vunpack.c.l.bf16 %v685_v61 }
 0x64a   :  { %v254_v3 = vadd.f32 1.0, %v808_v63 }
 0x64c   :  { %809 = vrcp.f32 %v254_v3 }
 0x659   :  { %v810_v4 = vpop.eup %809 }
 0x65a   :  { %v258_v8 = vmul.f32 %v810_v4, %v193_v48 }
 0x6ba   :  { %v261_v5 = vpop.permute.xlu1 %260 }
 0x6bb   :  { %v263_v6 = vmul.f32 %v810_v4, %v261_v5 }
 0x6bd   :  { %265 = vrot.lane.b32.xlu0 %v263_v6, %s856_s5 }
 0x72f   :  { %v266_v9 = vpop.permute.xlu0 %265 }
 0x730   :  { %v268_v10 = vadd.f32 %v266_v9, %v258_v8 }
 0x732   :  { %811 = vtanh.f32 %v268_v10 }
 0x73f   :  { %v812_v11 = vpop.eup %811 }
 0x740   :  { %271 = vrot.lane.b32.xlu1 %v812_v11, %s855_s28 }
 0x7b2   :  { %v272_v12 = vpop.permute.xlu1 %271 }
 0x7b3   :  { %v274_v13 = vmul.f32 %v810_v4, %v272_v12 }
 0x7b5   :  { %v275_v14 = vpack.c.bf16 %v274_v13, %v274_v13 }
 0x7b7   :  { %280 = vrot.lane.b32.xlu0 %v275_v14, %s856_s5 }
 0x829   :  { %v281_v15 = vpop.permute.xlu0 %280 }
 0x82a   :  { %747 = vmatmul.mubr.msk.bf16.vlgmr.msra.gmra.mxu1 %vm21_vm0, %v281_v15 }
 0x82b   :  { %759 = vmatpush3.bf16.msra.mxu1 %v887_v1  ;;  %762 = vmatprep.mubr.msk.bf16.mxu1 %vm854_vm1, %v853_v0 }
 0x82c   :  { %760 = vmatprep.subr.bf16.mxu1 %v853_v0 }
 0x82f   :  { %761 = vmatpush3.bf16.msra.mxu1 %v903_v2 }
 0x830   :  { %774 = vmatprep.subr.bf16.mxu1 %v853_v0 }
 0x8ea   :  { %v319_v18 = vpop.f32.mrf.mxu1 }
 0x8eb   :  { %v320_v19 = vadd.f32 %v319_v18, %v278_v17 }
 0x8ec   :  { %v748_v20 = vpop.f32.mrf.mxu1 }
 0x8ed   :  { %v325_v21 = vadd.f32 %v933_v7, %v320_v19 }
 0x8ee   :  { %v322_v22 = vpop.f32.mrf.mxu1 }
 0x8ef   :  { %813 = vtanh.f32 %v325_v21  ;;  %v681_v25 = vmul.f32 -1.442695, %v325_v21  ;;  %v503_v21 = vunpack.c.h.bf16 %v685_v61 }
 0x8f0   :  { %v749_v23 = vpop.f32.mrf.mxu1 }
 0x8f1   :  { %815 = vpow2.f32 %v681_v25 }
 0x8fc   :  { %v814_v24 = vpop.eup %813 }
 0x8fd   :  { %335 = vrot.lane.b32.xlu1 %v814_v24, %s855_s28 }
 0x8fe   :  { %v816_v26 = vpop.eup %815 }
 0x8ff   :  { %v329_v27 = vadd.f32 1.0, %v816_v26 }
 0x901   :  { %817 = vrcp.f32 %v329_v27 }
 0x90e   :  { %v818_v28 = vpop.eup %817 }
 0x90f   :  { %v333_v31 = vmul.f32 %v818_v28, %v268_v10 }
 0x96f   :  { %v336_v29 = vpop.permute.xlu1 %335 }
 0x970   :  { %v338_v30 = vmul.f32 %v818_v28, %v336_v29 }
 0x972   :  { %340 = vrot.lane.b32.xlu0 %v338_v30, %s856_s5 }
 0x9e4   :  { %v341_v32 = vpop.permute.xlu0 %340 }
 0x9e5   :  { %v343_v33 = vadd.f32 %v341_v32, %v333_v31 }
 0x9e7   :  { %819 = vtanh.f32 %v343_v33 }
 0x9f4   :  { %v820_v34 = vpop.eup %819 }
 0x9f5   :  { %346 = vrot.lane.b32.xlu1 %v820_v34, %s855_s28 }
 0xa67   :  { %v347_v35 = vpop.permute.xlu1 %346 }
 0xa68   :  { %v349_v36 = vmul.f32 %v818_v28, %v347_v35 }
 0xa6a   :  { %v350_v37 = vpack.c.bf16 %v349_v36, %v349_v36 }
 0xa6c   :  { %355 = vrot.lane.b32.xlu0 %v350_v37, %s856_s5 }
 0xade   :  { %v356_v38 = vpop.permute.xlu0 %355 }
 0xadf   :  { %755 = vmatmul.mubr.msk.bf16.vlgmr.msra.gmra.mxu0 %vm21_vm0, %v356_v38 }
 0xae0   :  { %767 = vmatpush3.bf16.msra.mxu0 %v887_v1  ;;  %770 = vmatprep.mubr.msk.bf16.mxu0 %vm854_vm1, %v853_v0 }
 0xae1   :  { %768 = vmatprep.subr.bf16.mxu0 %v853_v0 }
 0xae4   :  { %769 = vmatpush3.bf16.msra.mxu0 %v903_v2 }
 0xb9f   :  { %v394_v40 = vpop.f32.mrf.mxu0 }
 0xba0   :  { %v395_v41 = vadd.f32 %v394_v40, %v353_v39 }
 0xba1   :  { %v756_v42 = vpop.f32.mrf.mxu0 }
 0xba2   :  { %v400_v43 = vadd.f32 %v933_v7, %v395_v41 }
 0xba3   :  { %v397_v44 = vpop.f32.mrf.mxu0 }
 0xba4   :  { %821 = vtanh.f32 %v400_v43  ;;  %v684_v47 = vmul.f32 -1.442695, %v400_v43  ;;  %v691_v43 = vld [vmem:[%s1037_s0 + $0x1c] sm:$0xf]  ;;  %s857_s0 = smov 96  }
 0xba5   :  { %v757_v45 = vpop.f32.mrf.mxu0  ;;  %v578_v44 = vunpack.c.l.bf16 %v691_v43 }
 0xba6   :  { %823 = vpow2.f32 %v684_v47 }
 0xbb1   :  { %v822_v46 = vpop.eup %821 }
 0xbb2   :  { %410 = vrot.lane.b32.xlu1 %v822_v46, %s855_s28 }
 0xbb3   :  { %v824_v48 = vpop.eup %823 }
 0xbb4   :  { %v404_v49 = vadd.f32 1.0, %v824_v48 }
 0xbb6   :  { %825 = vrcp.f32 %v404_v49 }
 0xbc3   :  { %v826_v50 = vpop.eup %825 }
 0xbc4   :  { %v408_v53 = vmul.f32 %v826_v50, %v343_v33 }
 0xc24   :  { %v411_v51 = vpop.permute.xlu1 %410 }
 0xc25   :  { %v413_v52 = vmul.f32 %v826_v50, %v411_v51 }
 0xc27   :  { %415 = vrot.lane.b32.xlu0 %v413_v52, %s856_s5 }
 0xc99   :  { %v416_v54 = vpop.permute.xlu0 %415 }
 0xc9a   :  { %v418_v55 = vadd.f32 %v416_v54, %v408_v53 }
 0xc9c   :  { %827 = vtanh.f32 %v418_v55 }
 0xca9   :  { %v828_v56 = vpop.eup %827 }
 0xcaa   :  { %421 = vrot.lane.b32.xlu1 %v828_v56, %s855_s28 }
 0xd1c   :  { %v422_v57 = vpop.permute.xlu1 %421 }
 0xd1d   :  { %v424_v58 = vmul.f32 %v826_v50, %v422_v57 }
 0xd1f   :  { %v425_v59 = vpack.c.bf16 %v424_v58, %v424_v58 }
 0xd21   :  { %430 = vrot.lane.b32.xlu0 %v425_v59, %s856_s5 }
 0xd93   :  { %v431_v60 = vpop.permute.xlu0 %430 }
 0xd94   :  { %763 = vmatmul.mubr.msk.bf16.vlgmr.msra.gmra.mxu1 %vm21_vm0, %v431_v60 }
 0xd95   :  { %775 = vmatpush3.bf16.msra.mxu1 %v887_v1  ;;  %778 = vmatprep.mubr.msk.bf16.mxu1 %vm854_vm1, %v853_v0 }
 0xd96   :  { %776 = vmatprep.subr.bf16.mxu1 %v853_v0 }
 0xd99   :  { %777 = vmatpush3.bf16.msra.mxu1 %v903_v2 }
 0xe54   :  { %v469_v63 = vpop.f32.mrf.mxu1 }
 0xe55   :  { %v470_v3 = vadd.f32 %v469_v63, %v428_v62 }
 0xe56   :  { %v764_v4 = vpop.f32.mrf.mxu1 }
 0xe57   :  { %v475_v5 = vadd.f32 %v933_v7, %v470_v3 }
 0xe58   :  { %v472_v6 = vpop.f32.mrf.mxu1 }
 0xe59   :  { %829 = vtanh.f32 %v475_v5  ;;  %v687_v9 = vmul.f32 -1.442695, %v475_v5 }
 0xe5a   :  { %v765_v1 = vpop.f32.mrf.mxu1 }
 0xe5b   :  { %831 = vpow2.f32 %v687_v9 }
 0xe66   :  { %v830_v8 = vpop.eup %829 }
 0xe67   :  { %485 = vrot.lane.b32.xlu1 %v830_v8, %s855_s28 }
 0xe68   :  { %v832_v0 = vpop.eup %831 }
 0xe69   :  { %v479_v2 = vadd.f32 1.0, %v832_v0 }
 0xe6b   :  { %833 = vrcp.f32 %v479_v2 }
 0xe78   :  { %v834_v10 = vpop.eup %833 }
 0xe79   :  { %v483_v13 = vmul.f32 %v834_v10, %v418_v55 }
 0xed9   :  { %v486_v11 = vpop.permute.xlu1 %485 }
 0xeda   :  { %v488_v12 = vmul.f32 %v834_v10, %v486_v11 }
 0xedc   :  { %490 = vrot.lane.b32.xlu0 %v488_v12, %s856_s5 }
 0xf4e   :  { %v491_v14 = vpop.permute.xlu0 %490 }
 0xf4f   :  { %v493_v15 = vadd.f32 %v491_v14, %v483_v13 }
 0xf51   :  { %835 = vtanh.f32 %v493_v15 }
 0xf5e   :  { %v836_v16 = vpop.eup %835 }
 0xf5f   :  { %496 = vrot.lane.b32.xlu1 %v836_v16, %s855_s28 }
 0xfd1   :  { %v497_v17 = vpop.permute.xlu1 %496 }
 0xfd2   :  { %v499_v18 = vmul.f32 %v834_v10, %v497_v17 }
 0xfd4   :  { %v500_v19 = vpack.c.bf16 %v499_v18, %v499_v18 }
 0xfd6   :  { %505 = vrot.lane.b32.xlu0 %v500_v19, %s856_s5 }
0x1048   :  { %v506_v20 = vpop.permute.xlu0 %505 }
0x1049   :  { %771 = vmatmul.mubr.msk.bf16.vlgmr.msra.gmra.mxu0 %vm21_vm0, %v506_v20 }
0x1109   :  { %v544_v22 = vpop.f32.mrf.mxu0 }
0x110a   :  { %v545_v23 = vadd.f32 %v544_v22, %v503_v21 }
0x110b   :  { %v772_v24 = vpop.f32.mrf.mxu0 }
0x110c   :  { %v550_v25 = vadd.f32 %v933_v7, %v545_v23 }
0x110d   :  { %v547_v26 = vpop.f32.mrf.mxu0 }
0x110e   :  { %837 = vtanh.f32 %v550_v25  ;;  %v690_v29 = vmul.f32 -1.442695, %v550_v25 }
0x110f   :  { %v773_v27 = vpop.f32.mrf.mxu0 }
0x1110   :  { %839 = vpow2.f32 %v690_v29 }
0x111b   :  { %v838_v28 = vpop.eup %837 }
0x111c   :  { %560 = vrot.lane.b32.xlu1 %v838_v28, %s855_s28 }
0x111d   :  { %v840_v30 = vpop.eup %839 }
0x111e   :  { %v554_v31 = vadd.f32 1.0, %v840_v30 }
0x1120   :  { %841 = vrcp.f32 %v554_v31 }
0x112d   :  { %v842_v32 = vpop.eup %841 }
0x112e   :  { %v558_v35 = vmul.f32 %v842_v32, %v493_v15 }
0x118e   :  { %v561_v33 = vpop.permute.xlu1 %560 }
0x118f   :  { %v563_v34 = vmul.f32 %v842_v32, %v561_v33 }
0x1191   :  { %565 = vrot.lane.b32.xlu0 %v563_v34, %s856_s5 }
0x1203   :  { %v566_v36 = vpop.permute.xlu0 %565 }
0x1204   :  { %v568_v37 = vadd.f32 %v566_v36, %v558_v35 }
0x1206   :  { %843 = vtanh.f32 %v568_v37 }
0x1213   :  { %v844_v38 = vpop.eup %843 }
0x1214   :  { %571 = vrot.lane.b32.xlu1 %v844_v38, %s855_s28 }
0x1286   :  { %v572_v39 = vpop.permute.xlu1 %571 }
0x1287   :  { %v574_v40 = vmul.f32 %v842_v32, %v572_v39 }
0x1289   :  { %v575_v41 = vpack.c.bf16 %v574_v40, %v574_v40 }
0x128b   :  { %580 = vrot.lane.b32.xlu0 %v575_v41, %s856_s5 }
0x12fd   :  { %v581_v42 = vpop.permute.xlu0 %580 }
0x12fe   :  { %779 = vmatmul.mubr.msk.bf16.vlgmr.msra.gmra.mxu1 %vm21_vm0, %v581_v42 }
0x13be   :  { %v619_v45 = vpop.f32.mrf.mxu1 }
0x13bf   :  { %v620_v46 = vadd.f32 %v619_v45, %v578_v44 }
0x13c0   :  { %v780_v47 = vpop.f32.mrf.mxu1 }
0x13c1   :  { %v625_v48 = vadd.f32 %v933_v7, %v620_v46 }
0x13c2   :  { %v622_v49 = vpop.f32.mrf.mxu1 }
0x13c3   :  { %845 = vtanh.f32 %v625_v48  ;;  %v693_v52 = vmul.f32 -1.442695, %v625_v48 }
0x13c4   :  { %v781_v50 = vpop.f32.mrf.mxu1 }
0x13c5   :  { %847 = vpow2.f32 %v693_v52 }
0x13d0   :  { %v846_v51 = vpop.eup %845 }
0x13d1   :  { %635 = vrot.lane.b32.xlu1 %v846_v51, %s855_s28 }
0x13d2   :  { %v848_v53 = vpop.eup %847 }
0x13d3   :  { %v629_v54 = vadd.f32 1.0, %v848_v53 }
0x13d5   :  { %849 = vrcp.f32 %v629_v54 }
0x13e2   :  { %v850_v55 = vpop.eup %849 }
0x13e3   :  { %v633_v58 = vmul.f32 %v850_v55, %v568_v37 }
0x1443   :  { %v636_v56 = vpop.permute.xlu1 %635 }
0x1444   :  { %v638_v57 = vmul.f32 %v850_v55, %v636_v56 }
0x1446   :  { %640 = vrot.lane.b32.xlu0 %v638_v57, %s856_s5 }
0x14b8   :  { %v641_v59 = vpop.permute.xlu0 %640 }
0x14b9   :  { %v643_v60 = vadd.f32 %v641_v59, %v633_v58 }
0x14bb   :  { %851 = vtanh.f32 %v643_v60 }
0x14c8   :  { %v852_v7 = vpop.eup %851 }
0x14c9   :  { %646 = vrot.lane.b32.xlu1 %v852_v7, %s855_s28 }
0x14cd   :  { %656 = vrot.lane.b32.xlu1 %v643_v60, %s857_s0 }
0x153b   :  { %v647_v61 = vpop.permute.xlu1 %646 }
0x153c   :  { %v649_v62 = vmul.f32 %v850_v55, %v647_v61 }
0x153e   :  { %651 = vrot.lane.b32.xlu0 %v649_v62, %s856_s5 }
0x153f   :  { %v657_v63 = vpop.permute.xlu1 %656 }
0x1540   :  { %659 = vst.msk [vmem:[%s1036_s4] sm:$0xff] %vm21_vm0, %v657_v63 }
0x15b0   :  { %v652_v3 = vpop.permute.xlu0 %651 }
0x15b1   :  { %654 = vst.msk [vmem:[%s1035_s3] sm:$0xff] %vm21_vm0, %v652_v3 }

// kernel: encoder_forward.2
= control target key start
LH: loop header
LB: loop body
LE: loop exit
PB: predicated region body
PF: predicated region fallthrough
CT: control target
= control target key end

     0   :  { %vm25_vm0 = vcmask 261120   ;;  %v1334_v0 = vmov 0.0   ;;  %vm1335_vm1 = vmmov 0   ;;  %s1336_s10 = smov 64   ;;  %s1337_s13 = smov 32   ;;  %s1616_s2 = inlined_call_operand.vmem [shape: bf16[32,128], index: 2, kind: input, shape index: {}]   ;;  %s1617_s5 = inlined_call_operand.vmem [shape: f32[8,32], index: 5, kind: output, shape index: {1}]   ;;  %s1618_s6 = inlined_call_operand.vmem [shape: f32[8,32], index: 6, kind: output, shape index: {2}]   ;;  %s1619_s0 = inlined_call_operand.vmem [shape: bf16[8,8,128], index: 0, kind: input, shape index: {}]   ;;  %s1620_s1 = inlined_call_operand.vmem [shape: f32[1,128], index: 1, kind: input, shape index: {}]   ;;  %s1621_s3 = inlined_call_operand.vmem [shape: bf16[32,128], index: 3, kind: input, shape index: {}]   ;;  %s1622_s4 = inlined_call_operand.vmem [shape: bf16[8,8,128], index: 4, kind: output, shape index: {0}]  }
   0x1   :  { %1133 = vmatprep.subr.bf16.mxu0 %v1334_v0  ;;  %v1378_v1 = vld [vmem:[%s1616_s2 + $0x8] sm:$0xff]   ;;  %1137 = vmatprep.mubr.msk.bf16.mxu0 %vm1335_vm1, %v1334_v0  ;;  %26 = vst.msk [vmem:[%s1617_s5] sm:$0xff] %vm25_vm0, %v1334_v0  ;;  %v1394_v2 = vld [vmem:[%s1616_s2] sm:$0xff]   ;;  %27 = vst.msk [vmem:[%s1618_s6] sm:$0xff] %vm25_vm0, %v1334_v0 }
   0x2   :  { %1141 = vmatprep.subr.bf16.mxu1 %v1334_v0  ;;  %1145 = vmatprep.mubr.msk.bf16.mxu1 %vm1335_vm1, %v1334_v0  ;;  %v46_v5 = vld [vmem:[%s1619_s0] sm:$0xf]  ;;  %v1432_v26 = vld [vmem:[%s1621_s3 + $0x8] sm:$0xff]  }
   0x3   :  { %1134 = vmatpush3.bf16.msra.mxu0 %v1378_v1  ;;  %v47_v6 = vunpack.c.l.bf16 %v46_v5  ;;  %v1420_v7 = vld [vmem:[%s1620_s1] ss:$0 sm:$0xff]  ;;  %1142 = vmatpush3.bf16.msra.mxu1 %v1432_v26  ;;  %v1050_v33 = vld [vmem:[%s1619_s0 + $0x4] sm:$0xff]  }
   0x4   :  { %1135 = vmatprep.subr.bf16.mxu0 %v1334_v0  ;;  %v1438_v27 = vld [vmem:[%s1621_s3] sm:$0xff]   ;;  %1143 = vmatprep.subr.bf16.mxu1 %v1334_v0  ;;  %v196_v34 = vunpack.c.l.bf16 %v1050_v33  ;;  %v314_v61 = vunpack.c.h.bf16 %v1050_v33 }
   0x7   :  { %1136 = vmatpush3.bf16.msra.mxu0 %v1394_v2  ;;  %1144 = vmatpush3.bf16.msra.mxu1 %v1438_v27 }
   0x8   :  { %v43_v3 = vld [vmem:[%s1617_s5] sm:$0xff]  ;;  %1149 = vmatprep.subr.bf16.mxu0 %v1334_v0  ;;  %1157 = vmatprep.subr.bf16.mxu1 %v1334_v0 }
   0x9   :  { %v45_v4 = vpack.c.bf16 %v43_v3, %v43_v3  ;;  %v44_v15 = vld [vmem:[%s1618_s6] sm:$0xff] }
   0xb   :  { %1138 = vmatmul.mubr.msk.bf16.vlgmr.msra.gmra.mxu0 %vm25_vm0, %v45_v4 }
   0xc   :  { %1150 = vmatpush3.bf16.msra.mxu0 %v1378_v1  ;;  %1153 = vmatprep.mubr.msk.bf16.mxu0 %vm1335_vm1, %v1334_v0 }
   0xd   :  { %1151 = vmatprep.subr.bf16.mxu0 %v1334_v0 }
  0x10   :  { %1152 = vmatpush3.bf16.msra.mxu0 %v1394_v2 }
  0x11   :  { %1165 = vmatprep.subr.bf16.mxu0 %v1334_v0 }
  0xcb   :  { %v98_v8 = vpop.f32.mrf.mxu0 }
  0xcc   :  { %v99_v9 = vadd.f32 %v98_v8, %v47_v6 }
  0xcd   :  { %v1139_v10 = vpop.f32.mrf.mxu0 }
  0xce   :  { %v104_v11 = vadd.f32 %v1420_v7, %v99_v9 }
  0xcf   :  { %v101_v12 = vpop.f32.mrf.mxu0 }
  0xd0   :  { %1270 = vtanh.f32 %v104_v11  ;;  %v1046_v16 = vmul.f32 -1.442695, %v104_v11 }
  0xd1   :  { %v1140_v13 = vpop.f32.mrf.mxu0 }
  0xd2   :  { %1272 = vpow2.f32 %v1046_v16 }
  0xdd   :  { %v1271_v14 = vpop.eup %1270 }
  0xde   :  { %118 = vrot.lane.b32.xlu0 %v1271_v14, %s1336_s10 }
  0xdf   :  { %v1273_v17 = vpop.eup %1272 }
  0xe0   :  { %v108_v18 = vadd.f32 1.0, %v1273_v17 }
  0xe2   :  { %113 = vrot.lane.b32.xlu0 %v44_v15, %s1337_s13  ;;  %1274 = vrcp.f32 %v108_v18 }
  0xef   :  { %v1275_v19 = vpop.eup %1274 }
 0x150   :  { %v119_v20 = vpop.permute.xlu0 %118 }
 0x151   :  { %v121_v21 = vmul.f32 %v1275_v19, %v119_v20 }
 0x153   :  { %123 = vrot.lane.b32.xlu1 %v121_v21, %s1337_s13 }
 0x154   :  { %v114_v22 = vpop.permute.xlu0 %113 }
 0x155   :  { %v116_v23 = vmul.f32 %v1275_v19, %v114_v22 }
 0x1c5   :  { %v124_v24 = vpop.permute.xlu1 %123 }
 0x1c6   :  { %v126_v25 = vadd.f32 %v124_v24, %v116_v23 }
 0x1c8   :  { %1276 = vtanh.f32 %v126_v25 }
 0x1d5   :  { %v1277_v28 = vpop.eup %1276 }
 0x1d6   :  { %129 = vrot.lane.b32.xlu1 %v1277_v28, %s1336_s10 }
 0x248   :  { %v130_v29 = vpop.permute.xlu1 %129 }
 0x249   :  { %v132_v30 = vmul.f32 %v1275_v19, %v130_v29 }
 0x24b   :  { %v133_v31 = vpack.c.bf16 %v132_v30, %v132_v30  ;;  %v1060_v30 = vld [vmem:[%s1619_s0 + $0xc] sm:$0xff]  }
 0x24d   :  { %135 = vrot.lane.b32.xlu0 %v133_v31, %s1337_s13  ;;  %v432_v31 = vunpack.c.l.bf16 %v1060_v30 }
 0x2bf   :  { %v136_v32 = vpop.permute.xlu0 %135 }
 0x2c0   :  { %1146 = vmatmul.mubr.msk.bf16.vlgmr.msra.gmra.mxu1 %vm25_vm0, %v136_v32  ;;  %1154 = vmatmul.mubr.msk.bf16.vlgmr.msra.gmra.mxu0 %vm25_vm0, %v136_v32 }
 0x2c1   :  { %1166 = vmatpush3.bf16.msra.mxu0 %v1378_v1  ;;  %1158 = vmatpush3.bf16.msra.mxu1 %v1432_v26 }
 0x2c2   :  { %1167 = vmatprep.subr.bf16.mxu0 %v1334_v0  ;;  %1159 = vmatprep.subr.bf16.mxu1 %v1334_v0 }
 0x2c3   :  { %1169 = vmatprep.mubr.msk.bf16.mxu0 %vm1335_vm1, %v1334_v0  ;;  %1161 = vmatprep.mubr.msk.bf16.mxu1 %vm1335_vm1, %v1334_v0 }
 0x2c5   :  { %1168 = vmatpush3.bf16.msra.mxu0 %v1394_v2  ;;  %1160 = vmatpush3.bf16.msra.mxu1 %v1438_v27 }
 0x2c6   :  { %1181 = vmatprep.subr.bf16.mxu0 %v1334_v0  ;;  %1173 = vmatprep.subr.bf16.mxu1 %v1334_v0 }
 0x380   :  { %v186_v35 = vpop.f32.mrf.mxu1  ;;  %v231_v36 = vpop.f32.mrf.mxu0 }
 0x381   :  { %v192_v37 = vpack.c.bf16 %v186_v35, %v186_v35  ;;  %v232_v38 = vadd.f32 %v231_v36, %v196_v34 }
 0x382   :  { %v1147_v39 = vpop.f32.mrf.mxu1  ;;  %v1155_v40 = vpop.f32.mrf.mxu0 }
 0x383   :  { %193 = vst [vmem:[%s1622_s4] sm:$0xf] %v192_v37  ;;  %v237_v41 = vadd.f32 %v1420_v7, %v232_v38 }
 0x384   :  { %v189_v42 = vpop.f32.mrf.mxu1  ;;  %v234_v43 = vpop.f32.mrf.mxu0 }
 0x385   :  { %1278 = vtanh.f32 %v237_v41  ;;  %v1052_v47 = vmul.f32 -1.442695, %v237_v41 }
 0x386   :  { %v1148_v44 = vpop.f32.mrf.mxu1  ;;  %v1156_v45 = vpop.f32.mrf.mxu0 }
 0x387   :  { %1280 = vpow2.f32 %v1052_v47 }
 0x392   :  { %v1279_v46 = vpop.eup %1278 }
 0x393   :  { %247 = vrot.lane.b32.xlu1 %v1279_v46, %s1336_s10 }
 0x394   :  { %v1281_v48 = vpop.eup %1280 }
 0x395   :  { %v241_v49 = vadd.f32 1.0, %v1281_v48 }
 0x397   :  { %1282 = vrcp.f32 %v241_v49 }
 0x3a4   :  { %v1283_v50 = vpop.eup %1282 }
 0x3a5   :  { %v245_v53 = vmul.f32 %v1283_v50, %v126_v25 }
 0x405   :  { %v248_v51 = vpop.permute.xlu1 %247 }
 0x406   :  { %v250_v52 = vmul.f32 %v1283_v50, %v248_v51 }
 0x408   :  { %252 = vrot.lane.b32.xlu0 %v250_v52, %s1337_s13 }
 0x47a   :  { %v253_v54 = vpop.permute.xlu0 %252 }
 0x47b   :  { %v255_v55 = vadd.f32 %v253_v54, %v245_v53 }
 0x47d   :  { %1284 = vtanh.f32 %v255_v55 }
 0x48a   :  { %v1285_v56 = vpop.eup %1284 }
 0x48b   :  { %258 = vrot.lane.b32.xlu1 %v1285_v56, %s1336_s10 }
 0x4fd   :  { %v259_v57 = vpop.permute.xlu1 %258 }
 0x4fe   :  { %v261_v58 = vmul.f32 %v1283_v50, %v259_v57 }
 0x500   :  { %v262_v59 = vpack.c.bf16 %v261_v58, %v261_v58  ;;  %v550_v58 = vunpack.c.h.bf16 %v1060_v30 }
 0x502   :  { %264 = vrot.lane.b32.xlu0 %v262_v59, %s1337_s13 }
 0x574   :  { %v265_v60 = vpop.permute.xlu0 %264 }
 0x575   :  { %1162 = vmatmul.mubr.msk.bf16.vlgmr.msra.gmra.mxu1 %vm25_vm0, %v265_v60  ;;  %1170 = vmatmul.mubr.msk.bf16.vlgmr.msra.gmra.mxu0 %vm25_vm0, %v265_v60 }
 0x576   :  { %1182 = vmatpush3.bf16.msra.mxu0 %v1378_v1  ;;  %1174 = vmatpush3.bf16.msra.mxu1 %v1432_v26 }
 0x577   :  { %1183 = vmatprep.subr.bf16.mxu0 %v1334_v0  ;;  %1175 = vmatprep.subr.bf16.mxu1 %v1334_v0 }
 0x578   :  { %1185 = vmatprep.mubr.msk.bf16.mxu0 %vm1335_vm1, %v1334_v0  ;;  %1177 = vmatprep.mubr.msk.bf16.mxu1 %vm1335_vm1, %v1334_v0 }
 0x57a   :  { %1184 = vmatpush3.bf16.msra.mxu0 %v1394_v2  ;;  %1176 = vmatpush3.bf16.msra.mxu1 %v1438_v27 }
 0x57b   :  { %1197 = vmatprep.subr.bf16.mxu0 %v1334_v0  ;;  %1189 = vmatprep.subr.bf16.mxu1 %v1334_v0 }
 0x635   :  { %v303_v62 = vpop.f32.mrf.mxu1  ;;  %v349_v63 = vpop.f32.mrf.mxu0 }
 0x636   :  { %v309_v3 = vpack.c.bf16 %v303_v62, %v303_v62  ;;  %v350_v4 = vadd.f32 %v349_v63, %v314_v61 }
 0x637   :  { %v1163_v5 = vpop.f32.mrf.mxu1  ;;  %v1171_v6 = vpop.f32.mrf.mxu0 }
 0x638   :  { %1054 = vst [vmem:[%s1622_s4 + $0x4] sm:$0xf] %v309_v3  ;;  %v355_v8 = vadd.f32 %v1420_v7, %v350_v4 }
 0x639   :  { %v306_v9 = vpop.f32.mrf.mxu1  ;;  %v352_v10 = vpop.f32.mrf.mxu0 }
 0x63a   :  { %1286 = vtanh.f32 %v355_v8  ;;  %v1057_v14 = vmul.f32 -1.442695, %v355_v8 }
 0x63b   :  { %v1164_v11 = vpop.f32.mrf.mxu1  ;;  %v1172_v12 = vpop.f32.mrf.mxu0 }
 0x63c   :  { %1288 = vpow2.f32 %v1057_v14 }
 0x647   :  { %v1287_v13 = vpop.eup %1286 }
 0x648   :  { %365 = vrot.lane.b32.xlu1 %v1287_v13, %s1336_s10 }
 0x649   :  { %v1289_v15 = vpop.eup %1288 }
 0x64a   :  { %v359_v16 = vadd.f32 1.0, %v1289_v15 }
 0x64c   :  { %1290 = vrcp.f32 %v359_v16 }
 0x659   :  { %v1291_v17 = vpop.eup %1290 }
 0x65a   :  { %v363_v20 = vmul.f32 %v1291_v17, %v255_v55 }
 0x6ba   :  { %v366_v18 = vpop.permute.xlu1 %365 }
 0x6bb   :  { %v368_v19 = vmul.f32 %v1291_v17, %v366_v18 }
 0x6bd   :  { %370 = vrot.lane.b32.xlu0 %v368_v19, %s1337_s13 }
 0x72f   :  { %v371_v21 = vpop.permute.xlu0 %370 }
 0x730   :  { %v373_v22 = vadd.f32 %v371_v21, %v363_v20 }
 0x732   :  { %1292 = vtanh.f32 %v373_v22 }
 0x73f   :  { %v1293_v23 = vpop.eup %1292 }
 0x740   :  { %376 = vrot.lane.b32.xlu1 %v1293_v23, %s1336_s10 }
 0x7b2   :  { %v377_v24 = vpop.permute.xlu1 %376 }
 0x7b3   :  { %v379_v25 = vmul.f32 %v1291_v17, %v377_v24 }
 0x7b5   :  { %v380_v28 = vpack.c.bf16 %v379_v25, %v379_v25  ;;  %v1070_v25 = vld [vmem:[%s1619_s0 + $0x14] sm:$0xff]  }
 0x7b7   :  { %382 = vrot.lane.b32.xlu0 %v380_v28, %s1337_s13  ;;  %v668_v28 = vunpack.c.l.bf16 %v1070_v25 }
 0x829   :  { %v383_v29 = vpop.permute.xlu0 %382 }
 0x82a   :  { %1178 = vmatmul.mubr.msk.bf16.vlgmr.msra.gmra.mxu1 %vm25_vm0, %v383_v29  ;;  %1186 = vmatmul.mubr.msk.bf16.vlgmr.msra.gmra.mxu0 %vm25_vm0, %v383_v29 }
 0x82b   :  { %1198 = vmatpush3.bf16.msra.mxu0 %v1378_v1  ;;  %1190 = vmatpush3.bf16.msra.mxu1 %v1432_v26 }
 0x82c   :  { %1199 = vmatprep.subr.bf16.mxu0 %v1334_v0  ;;  %1191 = vmatprep.subr.bf16.mxu1 %v1334_v0 }
 0x82d   :  { %1201 = vmatprep.mubr.msk.bf16.mxu0 %vm1335_vm1, %v1334_v0  ;;  %1193 = vmatprep.mubr.msk.bf16.mxu1 %vm1335_vm1, %v1334_v0 }
 0x82f   :  { %1200 = vmatpush3.bf16.msra.mxu0 %v1394_v2  ;;  %1192 = vmatpush3.bf16.msra.mxu1 %v1438_v27 }
 0x830   :  { %1213 = vmatprep.subr.bf16.mxu0 %v1334_v0  ;;  %1205 = vmatprep.subr.bf16.mxu1 %v1334_v0 }
 0x8ea   :  { %v421_v32 = vpop.f32.mrf.mxu1  ;;  %v467_v33 = vpop.f32.mrf.mxu0 }
 0x8eb   :  { %v427_v34 = vpack.c.bf16 %v421_v32, %v421_v32  ;;  %v468_v35 = vadd.f32 %v467_v33, %v432_v31 }
 0x8ec   :  { %v1179_v36 = vpop.f32.mrf.mxu1  ;;  %v1187_v37 = vpop.f32.mrf.mxu0 }
 0x8ed   :  { %1059 = vst [vmem:[%s1622_s4 + $0x8] sm:$0xf] %v427_v34  ;;  %v473_v38 = vadd.f32 %v1420_v7, %v468_v35 }
 0x8ee   :  { %v424_v39 = vpop.f32.mrf.mxu1  ;;  %v470_v40 = vpop.f32.mrf.mxu0 }
 0x8ef   :  { %1294 = vtanh.f32 %v473_v38  ;;  %v1062_v44 = vmul.f32 -1.442695, %v473_v38 }
 0x8f0   :  { %v1180_v41 = vpop.f32.mrf.mxu1  ;;  %v1188_v42 = vpop.f32.mrf.mxu0 }
 0x8f1   :  { %1296 = vpow2.f32 %v1062_v44 }
 0x8fc   :  { %v1295_v43 = vpop.eup %1294 }
 0x8fd   :  { %483 = vrot.lane.b32.xlu1 %v1295_v43, %s1336_s10 }
 0x8fe   :  { %v1297_v45 = vpop.eup %1296 }
 0x8ff   :  { %v477_v46 = vadd.f32 1.0, %v1297_v45 }
 0x901   :  { %1298 = vrcp.f32 %v477_v46 }
 0x90e   :  { %v1299_v47 = vpop.eup %1298 }
 0x90f   :  { %v481_v50 = vmul.f32 %v1299_v47, %v373_v22 }
 0x96f   :  { %v484_v48 = vpop.permute.xlu1 %483 }
 0x970   :  { %v486_v49 = vmul.f32 %v1299_v47, %v484_v48 }
 0x972   :  { %488 = vrot.lane.b32.xlu0 %v486_v49, %s1337_s13 }
 0x9e4   :  { %v489_v51 = vpop.permute.xlu0 %488 }
 0x9e5   :  { %v491_v52 = vadd.f32 %v489_v51, %v481_v50 }
 0x9e7   :  { %1300 = vtanh.f32 %v491_v52 }
 0x9f4   :  { %v1301_v53 = vpop.eup %1300 }
 0x9f5   :  { %494 = vrot.lane.b32.xlu1 %v1301_v53, %s1336_s10 }
 0xa67   :  { %v495_v54 = vpop.permute.xlu1 %494 }
 0xa68   :  { %v497_v55 = vmul.f32 %v1299_v47, %v495_v54 }
 0xa6a   :  { %v498_v56 = vpack.c.bf16 %v497_v55, %v497_v55  ;;  %v786_v55 = vunpack.c.h.bf16 %v1070_v25 }
 0xa6c   :  { %500 = vrot.lane.b32.xlu0 %v498_v56, %s1337_s13 }
 0xade   :  { %v501_v57 = vpop.permute.xlu0 %500 }
 0xadf   :  { %1194 = vmatmul.mubr.msk.bf16.vlgmr.msra.gmra.mxu1 %vm25_vm0, %v501_v57  ;;  %1202 = vmatmul.mubr.msk.bf16.vlgmr.msra.gmra.mxu0 %vm25_vm0, %v501_v57 }
 0xae0   :  { %1214 = vmatpush3.bf16.msra.mxu0 %v1378_v1  ;;  %1206 = vmatpush3.bf16.msra.mxu1 %v1432_v26 }
 0xae1   :  { %1215 = vmatprep.subr.bf16.mxu0 %v1334_v0  ;;  %1207 = vmatprep.subr.bf16.mxu1 %v1334_v0 }
 0xae2   :  { %1217 = vmatprep.mubr.msk.bf16.mxu0 %vm1335_vm1, %v1334_v0  ;;  %1209 = vmatprep.mubr.msk.bf16.mxu1 %vm1335_vm1, %v1334_v0 }
 0xae4   :  { %1216 = vmatpush3.bf16.msra.mxu0 %v1394_v2  ;;  %1208 = vmatpush3.bf16.msra.mxu1 %v1438_v27 }
 0xae5   :  { %1229 = vmatprep.subr.bf16.mxu0 %v1334_v0  ;;  %1221 = vmatprep.subr.bf16.mxu1 %v1334_v0 }
 0xb9f   :  { %v539_v59 = vpop.f32.mrf.mxu1  ;;  %v585_v60 = vpop.f32.mrf.mxu0 }
 0xba0   :  { %v545_v61 = vpack.c.bf16 %v539_v59, %v539_v59  ;;  %v586_v62 = vadd.f32 %v585_v60, %v550_v58 }
 0xba1   :  { %v1195_v63 = vpop.f32.mrf.mxu1  ;;  %v1203_v3 = vpop.f32.mrf.mxu0 }
 0xba2   :  { %1064 = vst [vmem:[%s1622_s4 + $0xc] sm:$0xf] %v545_v61  ;;  %v591_v4 = vadd.f32 %v1420_v7, %v586_v62 }
 0xba3   :  { %v542_v5 = vpop.f32.mrf.mxu1  ;;  %v588_v6 = vpop.f32.mrf.mxu0 }
 0xba4   :  { %1302 = vtanh.f32 %v591_v4  ;;  %v1067_v11 = vmul.f32 -1.442695, %v591_v4 }
 0xba5   :  { %v1196_v8 = vpop.f32.mrf.mxu1  ;;  %v1204_v9 = vpop.f32.mrf.mxu0 }
 0xba6   :  { %1304 = vpow2.f32 %v1067_v11 }
 0xbb1   :  { %v1303_v10 = vpop.eup %1302 }
 0xbb2   :  { %601 = vrot.lane.b32.xlu1 %v1303_v10, %s1336_s10 }
 0xbb3   :  { %v1305_v12 = vpop.eup %1304 }
 0xbb4   :  { %v595_v13 = vadd.f32 1.0, %v1305_v12 }
 0xbb6   :  { %1306 = vrcp.f32 %v595_v13 }
 0xbc3   :  { %v1307_v14 = vpop.eup %1306 }
 0xbc4   :  { %v599_v17 = vmul.f32 %v1307_v14, %v491_v52 }
 0xc24   :  { %v602_v15 = vpop.permute.xlu1 %601 }
 0xc25   :  { %v604_v16 = vmul.f32 %v1307_v14, %v602_v15 }
 0xc27   :  { %606 = vrot.lane.b32.xlu0 %v604_v16, %s1337_s13 }
 0xc99   :  { %v607_v18 = vpop.permute.xlu0 %606 }
 0xc9a   :  { %v609_v19 = vadd.f32 %v607_v18, %v599_v17 }
 0xc9c   :  { %1308 = vtanh.f32 %v609_v19 }
 0xca9   :  { %v1309_v20 = vpop.eup %1308 }
 0xcaa   :  { %612 = vrot.lane.b32.xlu1 %v1309_v20, %s1336_s10  ;;  %v1080_v20 = vld [vmem:[%s1619_s0 + $0x1c] sm:$0xf]  ;;  %s1338_s0 = smov 96  }
 0xd1c   :  { %v613_v21 = vpop.permute.xlu1 %612 }
 0xd1d   :  { %v615_v22 = vmul.f32 %v1307_v14, %v613_v21  ;;  %v904_v21 = vunpack.c.l.bf16 %v1080_v20 }
 0xd1f   :  { %v616_v23 = vpack.c.bf16 %v615_v22, %v615_v22 }
 0xd21   :  { %618 = vrot.lane.b32.xlu0 %v616_v23, %s1337_s13 }
 0xd93   :  { %v619_v24 = vpop.permute.xlu0 %618 }
 0xd94   :  { %1210 = vmatmul.mubr.msk.bf16.vlgmr.msra.gmra.mxu1 %vm25_vm0, %v619_v24  ;;  %1218 = vmatmul.mubr.msk.bf16.vlgmr.msra.gmra.mxu0 %vm25_vm0, %v619_v24 }
 0xd95   :  { %1230 = vmatpush3.bf16.msra.mxu0 %v1378_v1  ;;  %1222 = vmatpush3.bf16.msra.mxu1 %v1432_v26 }
 0xd96   :  { %1231 = vmatprep.subr.bf16.mxu0 %v1334_v0  ;;  %1223 = vmatprep.subr.bf16.mxu1 %v1334_v0 }
 0xd97   :  { %1233 = vmatprep.mubr.msk.bf16.mxu0 %vm1335_vm1, %v1334_v0  ;;  %1225 = vmatprep.mubr.msk.bf16.mxu1 %vm1335_vm1, %v1334_v0 }
 0xd99   :  { %1232 = vmatpush3.bf16.msra.mxu0 %v1394_v2  ;;  %1224 = vmatpush3.bf16.msra.mxu1 %v1438_v27 }
 0xd9a   :  { %1245 = vmatprep.subr.bf16.mxu0 %v1334_v0  ;;  %1237 = vmatprep.subr.bf16.mxu1 %v1334_v0 }
 0xe54   :  { %v657_v29 = vpop.f32.mrf.mxu1  ;;  %v703_v30 = vpop.f32.mrf.mxu0 }
 0xe55   :  { %v663_v31 = vpack.c.bf16 %v657_v29, %v657_v29  ;;  %v704_v32 = vadd.f32 %v703_v30, %v668_v28 }
 0xe56   :  { %v1211_v33 = vpop.f32.mrf.mxu1  ;;  %v1219_v34 = vpop.f32.mrf.mxu0 }
 0xe57   :  { %1069 = vst [vmem:[%s1622_s4 + $0x10] sm:$0xf] %v663_v31  ;;  %v709_v35 = vadd.f32 %v1420_v7, %v704_v32 }
 0xe58   :  { %v660_v36 = vpop.f32.mrf.mxu1  ;;  %v706_v37 = vpop.f32.mrf.mxu0 }
 0xe59   :  { %1310 = vtanh.f32 %v709_v35  ;;  %v1072_v41 = vmul.f32 -1.442695, %v709_v35 }
 0xe5a   :  { %v1212_v38 = vpop.f32.mrf.mxu1  ;;  %v1220_v39 = vpop.f32.mrf.mxu0 }
 0xe5b   :  { %1312 = vpow2.f32 %v1072_v41 }
 0xe66   :  { %v1311_v40 = vpop.eup %1310 }
 0xe67   :  { %719 = vrot.lane.b32.xlu1 %v1311_v40, %s1336_s10 }
 0xe68   :  { %v1313_v42 = vpop.eup %1312 }
 0xe69   :  { %v713_v43 = vadd.f32 1.0, %v1313_v42 }
 0xe6b   :  { %1314 = vrcp.f32 %v713_v43 }
 0xe78   :  { %v1315_v44 = vpop.eup %1314 }
 0xe79   :  { %v717_v47 = vmul.f32 %v1315_v44, %v609_v19 }
 0xed9   :  { %v720_v45 = vpop.permute.xlu1 %719 }
 0xeda   :  { %v722_v46 = vmul.f32 %v1315_v44, %v720_v45 }
 0xedc   :  { %724 = vrot.lane.b32.xlu0 %v722_v46, %s1337_s13 }
 0xf4e   :  { %v725_v48 = vpop.permute.xlu0 %724 }
 0xf4f   :  { %v727_v49 = vadd.f32 %v725_v48, %v717_v47 }
 0xf51   :  { %1316 = vtanh.f32 %v727_v49 }
 0xf5e   :  { %v1317_v50 = vpop.eup %1316 }
 0xf5f   :  { %730 = vrot.lane.b32.xlu1 %v1317_v50, %s1336_s10 }
 0xfd1   :  { %v731_v51 = vpop.permute.xlu1 %730 }
 0xfd2   :  { %v733_v52 = vmul.f32 %v1315_v44, %v731_v51 }
 0xfd4   :  { %v734_v53 = vpack.c.bf16 %v733_v52, %v733_v52 }
 0xfd6   :  { %736 = vrot.lane.b32.xlu0 %v734_v53, %s1337_s13 }
0x1048   :  { %v737_v54 = vpop.permute.xlu0 %736 }
0x1049   :  { %1226 = vmatmul.mubr.msk.bf16.vlgmr.msra.gmra.mxu1 %vm25_vm0, %v737_v54  ;;  %1234 = vmatmul.mubr.msk.bf16.vlgmr.msra.gmra.mxu0 %vm25_vm0, %v737_v54 }
0x104a   :  { %1246 = vmatpush3.bf16.msra.mxu0 %v1378_v1  ;;  %1238 = vmatpush3.bf16.msra.mxu1 %v1432_v26 }
0x104b   :  { %1247 = vmatprep.subr.bf16.mxu0 %v1334_v0  ;;  %1239 = vmatprep.subr.bf16.mxu1 %v1334_v0 }
0x104c   :  { %1249 = vmatprep.mubr.msk.bf16.mxu0 %vm1335_vm1, %v1334_v0  ;;  %1241 = vmatprep.mubr.msk.bf16.mxu1 %vm1335_vm1, %v1334_v0 }
0x104e   :  { %1248 = vmatpush3.bf16.msra.mxu0 %v1394_v2  ;;  %1240 = vmatpush3.bf16.msra.mxu1 %v1438_v27 }
0x104f   :  { %1253 = vmatprep.subr.bf16.mxu1 %v1334_v0 }
0x1109   :  { %v775_v1 = vpop.f32.mrf.mxu1  ;;  %v821_v56 = vpop.f32.mrf.mxu0 }
0x110a   :  { %v781_v57 = vpack.c.bf16 %v775_v1, %v775_v1  ;;  %v822_v58 = vadd.f32 %v821_v56, %v786_v55 }
0x110b   :  { %v1227_v59 = vpop.f32.mrf.mxu1  ;;  %v1235_v60 = vpop.f32.mrf.mxu0 }
0x110c   :  { %1074 = vst [vmem:[%s1622_s4 + $0x14] sm:$0xf] %v781_v57  ;;  %v827_v61 = vadd.f32 %v1420_v7, %v822_v58 }
0x110d   :  { %v778_v62 = vpop.f32.mrf.mxu1  ;;  %v824_v63 = vpop.f32.mrf.mxu0 }
0x110e   :  { %1318 = vtanh.f32 %v827_v61  ;;  %v1077_v5 = vmul.f32 -1.442695, %v827_v61 }
0x110f   :  { %v1228_v2 = vpop.f32.mrf.mxu1  ;;  %v1236_v3 = vpop.f32.mrf.mxu0 }
0x1110   :  { %1320 = vpow2.f32 %v1077_v5 }
0x111b   :  { %v1319_v4 = vpop.eup %1318 }
0x111c   :  { %837 = vrot.lane.b32.xlu1 %v1319_v4, %s1336_s10 }
0x111d   :  { %v1321_v6 = vpop.eup %1320 }
0x111e   :  { %v831_v8 = vadd.f32 1.0, %v1321_v6 }
0x1120   :  { %1322 = vrcp.f32 %v831_v8 }
0x112d   :  { %v1323_v9 = vpop.eup %1322 }
0x112e   :  { %v835_v12 = vmul.f32 %v1323_v9, %v727_v49 }
0x118e   :  { %v838_v10 = vpop.permute.xlu1 %837 }
0x118f   :  { %v840_v11 = vmul.f32 %v1323_v9, %v838_v10 }
0x1191   :  { %842 = vrot.lane.b32.xlu0 %v840_v11, %s1337_s13 }
0x1203   :  { %v843_v13 = vpop.permute.xlu0 %842 }
0x1204   :  { %v845_v14 = vadd.f32 %v843_v13, %v835_v12 }
0x1206   :  { %1324 = vtanh.f32 %v845_v14 }
0x1213   :  { %v1325_v15 = vpop.eup %1324 }
0x1214   :  { %848 = vrot.lane.b32.xlu1 %v1325_v15, %s1336_s10 }
0x1286   :  { %v849_v16 = vpop.permute.xlu1 %848 }
0x1287   :  { %v851_v17 = vmul.f32 %v1323_v9, %v849_v16 }
0x1289   :  { %v852_v18 = vpack.c.bf16 %v851_v17, %v851_v17 }
0x128b   :  { %854 = vrot.lane.b32.xlu0 %v852_v18, %s1337_s13 }
0x12fd   :  { %v855_v19 = vpop.permute.xlu0 %854 }
0x12fe   :  { %1242 = vmatmul.mubr.msk.bf16.vlgmr.msra.gmra.mxu1 %vm25_vm0, %v855_v19  ;;  %1250 = vmatmul.mubr.msk.bf16.vlgmr.msra.gmra.mxu0 %vm25_vm0, %v855_v19 }
0x12ff   :  { %1254 = vmatpush3.bf16.msra.mxu1 %v1432_v26  ;;  %1257 = vmatprep.mubr.msk.bf16.mxu1 %vm1335_vm1, %v1334_v0 }
0x1300   :  { %1255 = vmatprep.subr.bf16.mxu1 %v1334_v0 }
0x1303   :  { %1256 = vmatpush3.bf16.msra.mxu1 %v1438_v27 }
0x13be   :  { %v893_v22 = vpop.f32.mrf.mxu1  ;;  %v939_v23 = vpop.f32.mrf.mxu0 }
0x13bf   :  { %v899_v24 = vpack.c.bf16 %v893_v22, %v893_v22  ;;  %v940_v25 = vadd.f32 %v939_v23, %v904_v21 }
0x13c0   :  { %v1243_v28 = vpop.f32.mrf.mxu1  ;;  %v1251_v29 = vpop.f32.mrf.mxu0 }
0x13c1   :  { %1079 = vst [vmem:[%s1622_s4 + $0x18] sm:$0xf] %v899_v24  ;;  %v945_v26 = vadd.f32 %v1420_v7, %v940_v25 }
0x13c2   :  { %v896_v0 = vpop.f32.mrf.mxu1  ;;  %v942_v30 = vpop.f32.mrf.mxu0 }
0x13c3   :  { %1326 = vtanh.f32 %v945_v26  ;;  %v1082_v33 = vmul.f32 -1.442695, %v945_v26 }
0x13c4   :  { %v1244_v27 = vpop.f32.mrf.mxu1  ;;  %v1252_v31 = vpop.f32.mrf.mxu0 }
0x13c5   :  { %1328 = vpow2.f32 %v1082_v33 }
0x13d0   :  { %v1327_v32 = vpop.eup %1326 }
0x13d1   :  { %955 = vrot.lane.b32.xlu1 %v1327_v32, %s1336_s10 }
0x13d2   :  { %v1329_v34 = vpop.eup %1328 }
0x13d3   :  { %v949_v35 = vadd.f32 1.0, %v1329_v34 }
0x13d5   :  { %1330 = vrcp.f32 %v949_v35 }
0x13e2   :  { %v1331_v36 = vpop.eup %1330 }
0x13e3   :  { %v953_v39 = vmul.f32 %v1331_v36, %v845_v14 }
0x1443   :  { %v956_v37 = vpop.permute.xlu1 %955 }
0x1444   :  { %v958_v38 = vmul.f32 %v1331_v36, %v956_v37 }
0x1446   :  { %960 = vrot.lane.b32.xlu0 %v958_v38, %s1337_s13 }
0x14b8   :  { %v961_v7 = vpop.permute.xlu0 %960 }
0x14b9   :  { %v963_v40 = vadd.f32 %v961_v7, %v953_v39 }
0x14bb   :  { %1332 = vtanh.f32 %v963_v40 }
0x14c8   :  { %v1333_v41 = vpop.eup %1332 }
0x14c9   :  { %966 = vrot.lane.b32.xlu1 %v1333_v41, %s1336_s10 }
0x153b   :  { %v967_v42 = vpop.permute.xlu1 %966 }
0x153c   :  { %v969_v43 = vmul.f32 %v1331_v36, %v967_v42 }
0x153e   :  { %v970_v44 = vpack.c.bf16 %v969_v43, %v969_v43  ;;  %1021 = vrot.lane.b32.xlu1 %v969_v43, %s1337_s13 }
0x1540   :  { %972 = vrot.lane.b32.xlu0 %v970_v44, %s1337_s13 }
0x1544   :  { %1026 = vrot.lane.b32.xlu0 %v963_v40, %s1338_s0 }
0x15b0   :  { %v1022_v45 = vpop.permute.xlu1 %1021 }
0x15b1   :  { %1024 = vst.msk [vmem:[%s1617_s5] sm:$0xff] %vm25_vm0, %v1022_v45 }
0x15b2   :  { %v973_v46 = vpop.permute.xlu0 %972 }
0x15b3   :  { %1258 = vmatmul.mubr.msk.bf16.vlgmr.msra.gmra.mxu1 %vm25_vm0, %v973_v46 }
0x15b6   :  { %v1027_v47 = vpop.permute.xlu0 %1026 }
0x15b7   :  { %1029 = vst.msk [vmem:[%s1618_s6] sm:$0xff] %vm25_vm0, %v1027_v47 }
0x1673   :  { %v1011_v48 = vpop.f32.mrf.mxu1 }
0x1674   :  { %v1017_v49 = vpack.c.bf16 %v1011_v48, %v1011_v48 }
0x1675   :  { %v1259_v50 = vpop.f32.mrf.mxu1 }
0x1676   :  { %1084 = vst [vmem:[%s1622_s4 + $0x1c] sm:$0xf] %v1017_v49 }
0x1677   :  { %v1014_v51 = vpop.f32.mrf.mxu1 }
0x1679   :  { %v1260_v52 = vpop.f32.mrf.mxu1 }

</bundles_post_ra>
